<compile_context>
chip_gen: v7x
topology: tpu7x:2x2x1
jax: 0.10.0
libtpu: 0.0.40
codegen_flags: <defaults>
</compile_context>

<pallas_src>
import functools

import jax
import jax.numpy as jnp
from jax.experimental import pallas as pl
from jax.experimental.pallas import tpu as pltpu

NEG_SLOPE = 0.1
WEIGHT_DTYPE = jnp.bfloat16      # storage dtype for all constant planes
MAX_MATMUL_LANES = 512           # cap on T*2F (widest lane dim of any matmul)


def _cmm(ar, ai, br, bi):
    """Complex matmul (ar + i*ai) @ (br + i*bi), plain 4-multiply form.

    bf16 weight operands are promoted to f32 by jnp; accumulation is f32.
    """
    rr = (jnp.dot(ar, br, preferred_element_type=jnp.float32)
          - jnp.dot(ai, bi, preferred_element_type=jnp.float32))
    ri = (jnp.dot(ar, bi, preferred_element_type=jnp.float32)
          + jnp.dot(ai, br, preferred_element_type=jnp.float32))
    return rr, ri


def _lrelu(x):
    return jnp.where(x >= 0.0, x, NEG_SLOPE * x)


def paft_dc_kernel(ksp_r, ksp_i,
                   idfh_r, idfh_i, dfh_r, dfh_i,
                   w1r, w1i, b1r, b1i,
                   w2r, w2i, b2r, b2i,
                   w3r, w3i, b3r, b3i,
                   idfwk_r, idfwk_i,
                   out_r, out_i):
    # Data layout: (H, slab_tile*W), column = slab*W + w  (lane-dense).
    kr = ksp_r[...]
    ki = ksp_i[...]

    # 1) x = ifft(ksp_in, dim=-2)  ==  IDFT_H @ ksp
    xr, xi = _cmm(idfh_r[...], idfh_i[...], kr, ki)

    # 2) complex MLP along W (block-diagonal kron weights, right-multiply)
    h1r, h1i = _cmm(xr, xi, w1r[...], w1i[...])
    h1r = _lrelu(h1r + b1r[...])
    h1i = _lrelu(h1i + b1i[...])

    h2r, h2i = _cmm(h1r, h1i, w2r[...], w2i[...])
    h2r = _lrelu(h2r + b2r[...])
    h2i = _lrelu(h2i + b2i[...])

    # 3) third linear with DFT_W pre-fused: y' = h2 @ (W3 @ DFT_W) + b3 @ DFT_W
    ypr, ypi = _cmm(h2r, h2i, w3r[...], w3i[...])
    ypr = ypr + b3r[...]
    ypi = ypi + b3i[...]

    # 4) finish fftn over (-2,-1): kp = DFT_H @ y'
    kpr, kpi = _cmm(dfh_r[...], dfh_i[...], ypr, ypi)

    # 5) data consistency: keep measured k-space where ksp_in != 0
    #    (mask computed from the float32 data planes).
    mask = jnp.logical_or(kr != 0.0, ki != 0.0)
    kpr = jnp.where(mask, kr, kpr)
    kpi = jnp.where(mask, ki, kpi)

    # 6) isp_pred = ifftn(kp, dim=(-2,-1)) == IDFT_H @ kp @ kron(I, IDFT_W)
    tr, ti = _cmm(idfh_r[...], idfh_i[...], kpr, kpi)
    o_r, o_i = _cmm(tr, ti, idfwk_r[...], idfwk_i[...])

    out_r[...] = o_r
    out_i[...] = o_i


def dft_matrices(n):
    """Returns (dft_r, dft_i, idft_r, idft_i) for torch.fft 'backward' norm."""
    idx = jnp.arange(n, dtype=jnp.float32)
    ang = 2.0 * jnp.pi * jnp.outer(idx, idx) / n
    dft_r = jnp.cos(ang)
    dft_i = -jnp.sin(ang)            # e^{-2pi i kn/N}
    idft_r = jnp.cos(ang) / n        # e^{+2pi i kn/N} / N
    idft_i = jnp.sin(ang) / n
    return dft_r, dft_i, idft_r, idft_i


def init_params(key, in_features):
    """Deterministic complex MLP parameters (PyTorch-style uniform init)."""
    F = in_features
    keys = jax.random.split(key, 12)

    def u(k, shape, fan_in):
        lim = 1.0 / jnp.sqrt(jnp.float32(fan_in))
        return jax.random.uniform(k, shape, jnp.float32, -lim, lim)

    # weights stored as (in, out) so the forward computes x @ W
    return dict(
        w1r=u(keys[0], (F, 2 * F), F),   w1i=u(keys[1], (F, 2 * F), F),
        b1r=u(keys[2], (1, 2 * F), F),   b1i=u(keys[3], (1, 2 * F), F),
        w2r=u(keys[4], (2 * F, 2 * F), 2 * F), w2i=u(keys[5], (2 * F, 2 * F), 2 * F),
        b2r=u(keys[6], (1, 2 * F), 2 * F),     b2i=u(keys[7], (1, 2 * F), 2 * F),
        w3r=u(keys[8], (2 * F, F), 2 * F),     w3i=u(keys[9], (2 * F, F), 2 * F),
        b3r=u(keys[10], (1, F), 2 * F),        b3i=u(keys[11], (1, F), 2 * F),
    )


def _choose_slab_tile(bc, w):
    """Largest divisor T of bc with T*2W <= MAX_MATMUL_LANES (kron-zero cap)."""
    cap = max(1, MAX_MATMUL_LANES // (2 * w))
    best = 1
    for d in range(1, bc + 1):
        if bc % d == 0 and d <= cap:
            best = d
    return best


@functools.partial(jax.jit, static_argnames=("slab_tile",))
def paft_dc_forward(ksp_r, ksp_i, params, slab_tile=None):
    B, C, H, W = ksp_r.shape
    BC = B * C
    if slab_tile is None:
        slab_tile = _choose_slab_tile(BC, W)
    assert BC % slab_tile == 0
    T = slab_tile
    G = BC // T

    # --- lane-dense layout: (H, BC*W), column = slab*W + w ---
    def to_lane(a):
        return a.reshape(BC, H, W).transpose(1, 0, 2).reshape(H, BC * W)

    def from_lane(a):
        return a.reshape(H, BC, W).transpose(1, 0, 2).reshape(B, C, H, W)

    kr2 = to_lane(ksp_r)
    ki2 = to_lane(ksp_i)

    # --- DFT matrices ---
    dfh_r, dfh_i, idfh_r, idfh_i = dft_matrices(H)
    dfw_r, dfw_i, idfw_r, idfw_i = dft_matrices(W)

    # --- complex params & wrapper-side fusions (tiny, traced once under jit) ---
    w1 = params["w1r"] + 1j * params["w1i"]
    w2 = params["w2r"] + 1j * params["w2i"]
    w3 = params["w3r"] + 1j * params["w3i"]
    b1 = params["b1r"] + 1j * params["b1i"]
    b2 = params["b2r"] + 1j * params["b2i"]
    b3 = params["b3r"] + 1j * params["b3i"]
    dfw = dfw_r + 1j * dfw_i
    idfw = idfw_r + 1j * idfw_i

    # Fuse the W-axis forward FFT into the third linear layer.
    w3f = w3 @ dfw                    # (2F, F)
    b3f = b3 @ dfw                    # (1, F)

    eye = jnp.eye(T, dtype=jnp.float32)

    def kron_ri(m):                   # complex (in,out) -> kron(I_T, m) planes
        k = jnp.kron(eye, m)
        return jnp.real(k), jnp.imag(k)

    def tile_ri(b):                   # complex (1,out) -> (1, T*out) planes
        t = jnp.tile(b, (1, T))
        return jnp.real(t), jnp.imag(t)

    w1kr, w1ki = kron_ri(w1)          # (T*F,  T*2F)
    w2kr, w2ki = kron_ri(w2)          # (T*2F, T*2F)
    w3kr, w3ki = kron_ri(w3f)         # (T*2F, T*F)
    idfwk_r, idfwk_i = kron_ri(idfw)  # (T*W,  T*W)
    b1tr, b1ti = tile_ri(b1)
    b2tr, b2ti = tile_ri(b2)
    b3tr, b3ti = tile_ri(b3f)

    weight_args = (
        idfh_r, idfh_i, dfh_r, dfh_i,
        w1kr, w1ki, b1tr, b1ti,
        w2kr, w2ki, b2tr, b2ti,
        w3kr, w3ki, b3tr, b3ti,
        idfwk_r, idfwk_i,
    )
    # Constants shipped / held as bf16 (halves DMA bytes + VMEM footprint);
    # matmuls accumulate in f32 via preferred_element_type.
    weight_args = tuple(a.astype(WEIGHT_DTYPE) for a in weight_args)

    data_spec = pl.BlockSpec((H, T * W), lambda g: (0, g))
    full_spec = lambda a: pl.BlockSpec(a.shape, lambda g: (0, 0))

    in_specs = [data_spec, data_spec] + [full_spec(a) for a in weight_args]
    out_specs = [data_spec, data_spec]
    out_shape = [jax.ShapeDtypeStruct((H, BC * W), jnp.float32),
                 jax.ShapeDtypeStruct((H, BC * W), jnp.float32)]

    out_r, out_i = pl.pallas_call(
        paft_dc_kernel,
        out_shape=out_shape,
        grid_spec=pltpu.PrefetchScalarGridSpec(
            num_scalar_prefetch=0,
            grid=(G,),
            in_specs=in_specs,
            out_specs=out_specs,
        ),
        compiler_params=pltpu.CompilerParams(
            dimension_semantics=("parallel",),   # shards slab groups on v7x when G >= 2
            vmem_limit_bytes=32 * 1024 * 1024,   # fits v5e/v6e/v7x scoped budgets
        ),
    )(kr2, ki2, *weight_args)

    return from_lane(out_r), from_lane(out_i)


def reference_forward(ksp_c, params):
    """Pure-JAX complex reference (uses jnp.fft) for validation."""
    w1 = params["w1r"] + 1j * params["w1i"]
    w2 = params["w2r"] + 1j * params["w2i"]
    w3 = params["w3r"] + 1j * params["w3i"]
    b1 = (params["b1r"] + 1j * params["b1i"])[0]
    b2 = (params["b2r"] + 1j * params["b2i"])[0]
    b3 = (params["b3r"] + 1j * params["b3i"])[0]

    def clrelu(z):
        return _lrelu(z.real) + 1j * _lrelu(z.imag)

    x = jnp.fft.ifft(ksp_c, axis=-2)
    h = clrelu(x @ w1 + b1)
    h = clrelu(h @ w2 + b2)
    y = h @ w3 + b3
    k = jnp.fft.fftn(y, axes=(-2, -1))
    k = jnp.where(ksp_c != 0, ksp_c, k)
    return jnp.fft.ifftn(k, axes=(-2, -1))


if __name__ == "__main__":
    B, C, H, W = 2, 4, 16, 16          # in_features = W = 16
    key = jax.random.PRNGKey(0)
    k_param, k_r, k_i = jax.random.split(key, 3)

    params = init_params(k_param, W)

    ksp_r = jax.random.normal(k_r, (B, C, H, W), jnp.float32)
    ksp_i = jax.random.normal(k_i, (B, C, H, W), jnp.float32)
    # simulate undersampling: zero out every other phase-encode line so the
    # data-consistency mask is non-trivial
    line_mask = (jnp.arange(H) % 2 == 0).astype(jnp.float32)[None, None, :, None]
    ksp_r = ksp_r * line_mask
    ksp_i = ksp_i * line_mask

    out_r, out_i = paft_dc_forward(ksp_r, ksp_i, params)
    jax.block_until_ready((out_r, out_i))

    ref = reference_forward(ksp_r + 1j * ksp_i, params)
    # Tolerance documents bf16 storage of the weight/DFT planes on top of the
    # MXU's default (bf16-pass) f32 matmul precision over the chained DFT +
    # MLP matmuls; measured output magnitudes here are O(0.1).
    assert jnp.allclose(out_r, ref.real, atol=1e-2, rtol=1e-2), "real mismatch"
    assert jnp.allclose(out_i, ref.imag, atol=1e-2, rtol=1e-2), "imag mismatch"

    print("KERNEL_OK")
</pallas_src>

<mosaic_0001>
module attributes {stable_mosaic.version = 11 : i64} {
  func.func @paft_dc_kernel(%arg0: i32, %arg1: memref<16x128xf32, #tpu.memory_space<vmem>>, %arg2: memref<16x128xf32, #tpu.memory_space<vmem>>, %arg3: memref<16x16xbf16, #tpu.memory_space<vmem>>, %arg4: memref<16x16xbf16, #tpu.memory_space<vmem>>, %arg5: memref<16x16xbf16, #tpu.memory_space<vmem>>, %arg6: memref<16x16xbf16, #tpu.memory_space<vmem>>, %arg7: memref<128x256xbf16, #tpu.memory_space<vmem>>, %arg8: memref<128x256xbf16, #tpu.memory_space<vmem>>, %arg9: memref<1x256xbf16, #tpu.memory_space<vmem>>, %arg10: memref<1x256xbf16, #tpu.memory_space<vmem>>, %arg11: memref<256x256xbf16, #tpu.memory_space<vmem>>, %arg12: memref<256x256xbf16, #tpu.memory_space<vmem>>, %arg13: memref<1x256xbf16, #tpu.memory_space<vmem>>, %arg14: memref<1x256xbf16, #tpu.memory_space<vmem>>, %arg15: memref<256x128xbf16, #tpu.memory_space<vmem>>, %arg16: memref<256x128xbf16, #tpu.memory_space<vmem>>, %arg17: memref<1x128xbf16, #tpu.memory_space<vmem>>, %arg18: memref<1x128xbf16, #tpu.memory_space<vmem>>, %arg19: memref<128x128xbf16, #tpu.memory_space<vmem>>, %arg20: memref<128x128xbf16, #tpu.memory_space<vmem>>, %arg21: memref<16x128xf32, #tpu.memory_space<vmem>>, %arg22: memref<16x128xf32, #tpu.memory_space<vmem>>) attributes {dimension_semantics = [#tpu.dimension_semantics<parallel>], iteration_bounds = array<i64: 1>, scalar_prefetch = 0 : i64, scratch_operands = 0 : i64, tpu.core_type = #tpu.core_type<tc>, window_params = [{transform_indices = @transform_0, window_bounds = array<i64: 16, 128>}, {transform_indices = @transform_1, window_bounds = array<i64: 16, 128>}, {pipeline_mode = #tpu.pipeline_mode<synchronous>, transform_indices = @transform_2, window_bounds = array<i64: 16, 16>}, {pipeline_mode = #tpu.pipeline_mode<synchronous>, transform_indices = @transform_3, window_bounds = array<i64: 16, 16>}, {pipeline_mode = #tpu.pipeline_mode<synchronous>, transform_indices = @transform_4, window_bounds = array<i64: 16, 16>}, {pipeline_mode = #tpu.pipeline_mode<synchronous>, transform_indices = @transform_5, window_bounds = array<i64: 16, 16>}, {pipeline_mode = #tpu.pipeline_mode<synchronous>, transform_indices = @transform_6, window_bounds = array<i64: 128, 256>}, {pipeline_mode = #tpu.pipeline_mode<synchronous>, transform_indices = @transform_7, window_bounds = array<i64: 128, 256>}, {pipeline_mode = #tpu.pipeline_mode<synchronous>, transform_indices = @transform_8, window_bounds = array<i64: 1, 256>}, {pipeline_mode = #tpu.pipeline_mode<synchronous>, transform_indices = @transform_9, window_bounds = array<i64: 1, 256>}, {pipeline_mode = #tpu.pipeline_mode<synchronous>, transform_indices = @transform_10, window_bounds = array<i64: 256, 256>}, {pipeline_mode = #tpu.pipeline_mode<synchronous>, transform_indices = @transform_11, window_bounds = array<i64: 256, 256>}, {pipeline_mode = #tpu.pipeline_mode<synchronous>, transform_indices = @transform_12, window_bounds = array<i64: 1, 256>}, {pipeline_mode = #tpu.pipeline_mode<synchronous>, transform_indices = @transform_13, window_bounds = array<i64: 1, 256>}, {pipeline_mode = #tpu.pipeline_mode<synchronous>, transform_indices = @transform_14, window_bounds = array<i64: 256, 128>}, {pipeline_mode = #tpu.pipeline_mode<synchronous>, transform_indices = @transform_15, window_bounds = array<i64: 256, 128>}, {pipeline_mode = #tpu.pipeline_mode<synchronous>, transform_indices = @transform_16, window_bounds = array<i64: 1, 128>}, {pipeline_mode = #tpu.pipeline_mode<synchronous>, transform_indices = @transform_17, window_bounds = array<i64: 1, 128>}, {pipeline_mode = #tpu.pipeline_mode<synchronous>, transform_indices = @transform_18, window_bounds = array<i64: 128, 128>}, {pipeline_mode = #tpu.pipeline_mode<synchronous>, transform_indices = @transform_19, window_bounds = array<i64: 128, 128>}, {transform_indices = @transform_20, window_bounds = array<i64: 16, 128>}, {transform_indices = @transform_21, window_bounds = array<i64: 16, 128>}]} {
    %c0 = arith.constant 0 : index
    %c0_0 = arith.constant 0 : index
    %0 = vector.load %arg1[%c0, %c0_0] : memref<16x128xf32, #tpu.memory_space<vmem>>, vector<16x128xf32>
    %c0_1 = arith.constant 0 : index
    %c0_2 = arith.constant 0 : index
    %1 = vector.load %arg2[%c0_1, %c0_2] : memref<16x128xf32, #tpu.memory_space<vmem>>, vector<16x128xf32>
    %c0_3 = arith.constant 0 : index
    %c0_4 = arith.constant 0 : index
    %2 = vector.load %arg3[%c0_3, %c0_4] : memref<16x16xbf16, #tpu.memory_space<vmem>>, vector<16x16xbf16>
    %c0_5 = arith.constant 0 : index
    %c0_6 = arith.constant 0 : index
    %3 = vector.load %arg4[%c0_5, %c0_6] : memref<16x16xbf16, #tpu.memory_space<vmem>>, vector<16x16xbf16>
    %cst = arith.constant dense<0.000000e+00> : vector<16x128xf32>
    %4 = tpu.matmul %2, %0, %cst {dimension_numbers = #tpu.dot_dimension_numbers<[1], [0], [0], [1], [0, 0, 1, 1], [], []>} : vector<16x16xbf16>, vector<16x128xf32>, vector<16x128xf32> -> vector<16x128xf32>
    %cst_7 = arith.constant dense<0.000000e+00> : vector<16x128xf32>
    %5 = tpu.matmul %3, %1, %cst_7 {dimension_numbers = #tpu.dot_dimension_numbers<[1], [0], [0], [1], [0, 0, 1, 1], [], []>} : vector<16x16xbf16>, vector<16x128xf32>, vector<16x128xf32> -> vector<16x128xf32>
    %6 = arith.subf %4, %5 : vector<16x128xf32>
    %cst_8 = arith.constant dense<0.000000e+00> : vector<16x128xf32>
    %7 = tpu.matmul %2, %1, %cst_8 {dimension_numbers = #tpu.dot_dimension_numbers<[1], [0], [0], [1], [0, 0, 1, 1], [], []>} : vector<16x16xbf16>, vector<16x128xf32>, vector<16x128xf32> -> vector<16x128xf32>
    %cst_9 = arith.constant dense<0.000000e+00> : vector<16x128xf32>
    %8 = tpu.matmul %3, %0, %cst_9 {dimension_numbers = #tpu.dot_dimension_numbers<[1], [0], [0], [1], [0, 0, 1, 1], [], []>} : vector<16x16xbf16>, vector<16x128xf32>, vector<16x128xf32> -> vector<16x128xf32>
    %9 = arith.addf %7, %8 : vector<16x128xf32>
    %c0_10 = arith.constant 0 : index
    %c0_11 = arith.constant 0 : index
    %10 = vector.load %arg7[%c0_10, %c0_11] : memref<128x256xbf16, #tpu.memory_space<vmem>>, vector<128x256xbf16>
    %c0_12 = arith.constant 0 : index
    %c0_13 = arith.constant 0 : index
    %11 = vector.load %arg8[%c0_12, %c0_13] : memref<128x256xbf16, #tpu.memory_space<vmem>>, vector<128x256xbf16>
    %cst_14 = arith.constant dense<0.000000e+00> : vector<16x256xf32>
    %12 = tpu.matmul %6, %10, %cst_14 {dimension_numbers = #tpu.dot_dimension_numbers<[1], [0], [0], [1], [0, 0, 1, 1], [], []>} : vector<16x128xf32>, vector<128x256xbf16>, vector<16x256xf32> -> vector<16x256xf32>
    %cst_15 = arith.constant dense<0.000000e+00> : vector<16x256xf32>
    %13 = tpu.matmul %9, %11, %cst_15 {dimension_numbers = #tpu.dot_dimension_numbers<[1], [0], [0], [1], [0, 0, 1, 1], [], []>} : vector<16x128xf32>, vector<128x256xbf16>, vector<16x256xf32> -> vector<16x256xf32>
    %14 = arith.subf %12, %13 : vector<16x256xf32>
    %cst_16 = arith.constant dense<0.000000e+00> : vector<16x256xf32>
    %15 = tpu.matmul %6, %11, %cst_16 {dimension_numbers = #tpu.dot_dimension_numbers<[1], [0], [0], [1], [0, 0, 1, 1], [], []>} : vector<16x128xf32>, vector<128x256xbf16>, vector<16x256xf32> -> vector<16x256xf32>
    %cst_17 = arith.constant dense<0.000000e+00> : vector<16x256xf32>
    %16 = tpu.matmul %9, %10, %cst_17 {dimension_numbers = #tpu.dot_dimension_numbers<[1], [0], [0], [1], [0, 0, 1, 1], [], []>} : vector<16x128xf32>, vector<128x256xbf16>, vector<16x256xf32> -> vector<16x256xf32>
    %17 = arith.addf %15, %16 : vector<16x256xf32>
    %c0_18 = arith.constant 0 : index
    %c0_19 = arith.constant 0 : index
    %18 = vector.load %arg9[%c0_18, %c0_19] : memref<1x256xbf16, #tpu.memory_space<vmem>>, vector<1x256xbf16>
    %19 = arith.extf %18 : vector<1x256xbf16> to vector<1x256xf32>
    %20 = vector.broadcast %19 : vector<1x256xf32> to vector<16x256xf32>
    %21 = arith.addf %14, %20 : vector<16x256xf32>
    %cst_20 = arith.constant 0.000000e+00 : f32
    %22 = vector.broadcast %cst_20 : f32 to vector<16x256xf32>
    %23 = arith.cmpf oge, %21, %22 : vector<16x256xf32>
    %cst_21 = arith.constant 1.000000e-01 : f32
    %24 = vector.broadcast %cst_21 : f32 to vector<16x256xf32>
    %25 = arith.mulf %24, %21 : vector<16x256xf32>
    %26 = arith.select %23, %21, %25 : vector<16x256xi1>, vector<16x256xf32>
    %c0_22 = arith.constant 0 : index
    %c0_23 = arith.constant 0 : index
    %27 = vector.load %arg10[%c0_22, %c0_23] : memref<1x256xbf16, #tpu.memory_space<vmem>>, vector<1x256xbf16>
    %28 = arith.extf %27 : vector<1x256xbf16> to vector<1x256xf32>
    %29 = vector.broadcast %28 : vector<1x256xf32> to vector<16x256xf32>
    %30 = arith.addf %17, %29 : vector<16x256xf32>
    %cst_24 = arith.constant 0.000000e+00 : f32
    %31 = vector.broadcast %cst_24 : f32 to vector<16x256xf32>
    %32 = arith.cmpf oge, %30, %31 : vector<16x256xf32>
    %cst_25 = arith.constant 1.000000e-01 : f32
    %33 = vector.broadcast %cst_25 : f32 to vector<16x256xf32>
    %34 = arith.mulf %33, %30 : vector<16x256xf32>
    %35 = arith.select %32, %30, %34 : vector<16x256xi1>, vector<16x256xf32>
    %c0_26 = arith.constant 0 : index
    %c0_27 = arith.constant 0 : index
    %36 = vector.load %arg11[%c0_26, %c0_27] : memref<256x256xbf16, #tpu.memory_space<vmem>>, vector<256x256xbf16>
    %c0_28 = arith.constant 0 : index
    %c0_29 = arith.constant 0 : index
    %37 = vector.load %arg12[%c0_28, %c0_29] : memref<256x256xbf16, #tpu.memory_space<vmem>>, vector<256x256xbf16>
    %cst_30 = arith.constant dense<0.000000e+00> : vector<16x256xf32>
    %38 = tpu.matmul %26, %36, %cst_30 {dimension_numbers = #tpu.dot_dimension_numbers<[1], [0], [0], [1], [0, 0, 1, 1], [], []>} : vector<16x256xf32>, vector<256x256xbf16>, vector<16x256xf32> -> vector<16x256xf32>
    %cst_31 = arith.constant dense<0.000000e+00> : vector<16x256xf32>
    %39 = tpu.matmul %35, %37, %cst_31 {dimension_numbers = #tpu.dot_dimension_numbers<[1], [0], [0], [1], [0, 0, 1, 1], [], []>} : vector<16x256xf32>, vector<256x256xbf16>, vector<16x256xf32> -> vector<16x256xf32>
    %40 = arith.subf %38, %39 : vector<16x256xf32>
    %cst_32 = arith.constant dense<0.000000e+00> : vector<16x256xf32>
    %41 = tpu.matmul %26, %37, %cst_32 {dimension_numbers = #tpu.dot_dimension_numbers<[1], [0], [0], [1], [0, 0, 1, 1], [], []>} : vector<16x256xf32>, vector<256x256xbf16>, vector<16x256xf32> -> vector<16x256xf32>
    %cst_33 = arith.constant dense<0.000000e+00> : vector<16x256xf32>
    %42 = tpu.matmul %35, %36, %cst_33 {dimension_numbers = #tpu.dot_dimension_numbers<[1], [0], [0], [1], [0, 0, 1, 1], [], []>} : vector<16x256xf32>, vector<256x256xbf16>, vector<16x256xf32> -> vector<16x256xf32>
    %43 = arith.addf %41, %42 : vector<16x256xf32>
    %c0_34 = arith.constant 0 : index
    %c0_35 = arith.constant 0 : index
    %44 = vector.load %arg13[%c0_34, %c0_35] : memref<1x256xbf16, #tpu.memory_space<vmem>>, vector<1x256xbf16>
    %45 = arith.extf %44 : vector<1x256xbf16> to vector<1x256xf32>
    %46 = vector.broadcast %45 : vector<1x256xf32> to vector<16x256xf32>
    %47 = arith.addf %40, %46 : vector<16x256xf32>
    %cst_36 = arith.constant 0.000000e+00 : f32
    %48 = vector.broadcast %cst_36 : f32 to vector<16x256xf32>
    %49 = arith.cmpf oge, %47, %48 : vector<16x256xf32>
    %cst_37 = arith.constant 1.000000e-01 : f32
    %50 = vector.broadcast %cst_37 : f32 to vector<16x256xf32>
    %51 = arith.mulf %50, %47 : vector<16x256xf32>
    %52 = arith.select %49, %47, %51 : vector<16x256xi1>, vector<16x256xf32>
    %c0_38 = arith.constant 0 : index
    %c0_39 = arith.constant 0 : index
    %53 = vector.load %arg14[%c0_38, %c0_39] : memref<1x256xbf16, #tpu.memory_space<vmem>>, vector<1x256xbf16>
    %54 = arith.extf %53 : vector<1x256xbf16> to vector<1x256xf32>
    %55 = vector.broadcast %54 : vector<1x256xf32> to vector<16x256xf32>
    %56 = arith.addf %43, %55 : vector<16x256xf32>
    %cst_40 = arith.constant 0.000000e+00 : f32
    %57 = vector.broadcast %cst_40 : f32 to vector<16x256xf32>
    %58 = arith.cmpf oge, %56, %57 : vector<16x256xf32>
    %cst_41 = arith.constant 1.000000e-01 : f32
    %59 = vector.broadcast %cst_41 : f32 to vector<16x256xf32>
    %60 = arith.mulf %59, %56 : vector<16x256xf32>
    %61 = arith.select %58, %56, %60 : vector<16x256xi1>, vector<16x256xf32>
    %c0_42 = arith.constant 0 : index
    %c0_43 = arith.constant 0 : index
    %62 = vector.load %arg15[%c0_42, %c0_43] : memref<256x128xbf16, #tpu.memory_space<vmem>>, vector<256x128xbf16>
    %c0_44 = arith.constant 0 : index
    %c0_45 = arith.constant 0 : index
    %63 = vector.load %arg16[%c0_44, %c0_45] : memref<256x128xbf16, #tpu.memory_space<vmem>>, vector<256x128xbf16>
    %cst_46 = arith.constant dense<0.000000e+00> : vector<16x128xf32>
    %64 = tpu.matmul %52, %62, %cst_46 {dimension_numbers = #tpu.dot_dimension_numbers<[1], [0], [0], [1], [0, 0, 1, 1], [], []>} : vector<16x256xf32>, vector<256x128xbf16>, vector<16x128xf32> -> vector<16x128xf32>
    %cst_47 = arith.constant dense<0.000000e+00> : vector<16x128xf32>
    %65 = tpu.matmul %61, %63, %cst_47 {dimension_numbers = #tpu.dot_dimension_numbers<[1], [0], [0], [1], [0, 0, 1, 1], [], []>} : vector<16x256xf32>, vector<256x128xbf16>, vector<16x128xf32> -> vector<16x128xf32>
    %66 = arith.subf %64, %65 : vector<16x128xf32>
    %cst_48 = arith.constant dense<0.000000e+00> : vector<16x128xf32>
    %67 = tpu.matmul %52, %63, %cst_48 {dimension_numbers = #tpu.dot_dimension_numbers<[1], [0], [0], [1], [0, 0, 1, 1], [], []>} : vector<16x256xf32>, vector<256x128xbf16>, vector<16x128xf32> -> vector<16x128xf32>
    %cst_49 = arith.constant dense<0.000000e+00> : vector<16x128xf32>
    %68 = tpu.matmul %61, %62, %cst_49 {dimension_numbers = #tpu.dot_dimension_numbers<[1], [0], [0], [1], [0, 0, 1, 1], [], []>} : vector<16x256xf32>, vector<256x128xbf16>, vector<16x128xf32> -> vector<16x128xf32>
    %69 = arith.addf %67, %68 : vector<16x128xf32>
    %c0_50 = arith.constant 0 : index
    %c0_51 = arith.constant 0 : index
    %70 = vector.load %arg17[%c0_50, %c0_51] : memref<1x128xbf16, #tpu.memory_space<vmem>>, vector<1x128xbf16>
    %71 = arith.extf %70 : vector<1x128xbf16> to vector<1x128xf32>
    %72 = vector.broadcast %71 : vector<1x128xf32> to vector<16x128xf32>
    %73 = arith.addf %66, %72 : vector<16x128xf32>
    %c0_52 = arith.constant 0 : index
    %c0_53 = arith.constant 0 : index
    %74 = vector.load %arg18[%c0_52, %c0_53] : memref<1x128xbf16, #tpu.memory_space<vmem>>, vector<1x128xbf16>
    %75 = arith.extf %74 : vector<1x128xbf16> to vector<1x128xf32>
    %76 = vector.broadcast %75 : vector<1x128xf32> to vector<16x128xf32>
    %77 = arith.addf %69, %76 : vector<16x128xf32>
    %c0_54 = arith.constant 0 : index
    %c0_55 = arith.constant 0 : index
    %78 = vector.load %arg5[%c0_54, %c0_55] : memref<16x16xbf16, #tpu.memory_space<vmem>>, vector<16x16xbf16>
    %c0_56 = arith.constant 0 : index
    %c0_57 = arith.constant 0 : index
    %79 = vector.load %arg6[%c0_56, %c0_57] : memref<16x16xbf16, #tpu.memory_space<vmem>>, vector<16x16xbf16>
    %cst_58 = arith.constant dense<0.000000e+00> : vector<16x128xf32>
    %80 = tpu.matmul %78, %73, %cst_58 {dimension_numbers = #tpu.dot_dimension_numbers<[1], [0], [0], [1], [0, 0, 1, 1], [], []>} : vector<16x16xbf16>, vector<16x128xf32>, vector<16x128xf32> -> vector<16x128xf32>
    %cst_59 = arith.constant dense<0.000000e+00> : vector<16x128xf32>
    %81 = tpu.matmul %79, %77, %cst_59 {dimension_numbers = #tpu.dot_dimension_numbers<[1], [0], [0], [1], [0, 0, 1, 1], [], []>} : vector<16x16xbf16>, vector<16x128xf32>, vector<16x128xf32> -> vector<16x128xf32>
    %82 = arith.subf %80, %81 : vector<16x128xf32>
    %cst_60 = arith.constant dense<0.000000e+00> : vector<16x128xf32>
    %83 = tpu.matmul %78, %77, %cst_60 {dimension_numbers = #tpu.dot_dimension_numbers<[1], [0], [0], [1], [0, 0, 1, 1], [], []>} : vector<16x16xbf16>, vector<16x128xf32>, vector<16x128xf32> -> vector<16x128xf32>
    %cst_61 = arith.constant dense<0.000000e+00> : vector<16x128xf32>
    %84 = tpu.matmul %79, %73, %cst_61 {dimension_numbers = #tpu.dot_dimension_numbers<[1], [0], [0], [1], [0, 0, 1, 1], [], []>} : vector<16x16xbf16>, vector<16x128xf32>, vector<16x128xf32> -> vector<16x128xf32>
    %85 = arith.addf %83, %84 : vector<16x128xf32>
    %cst_62 = arith.constant 0.000000e+00 : f32
    %86 = vector.broadcast %cst_62 : f32 to vector<16x128xf32>
    %87 = arith.cmpf one, %0, %86 : vector<16x128xf32>
    %cst_63 = arith.constant 0.000000e+00 : f32
    %88 = vector.broadcast %cst_63 : f32 to vector<16x128xf32>
    %89 = arith.cmpf one, %1, %88 : vector<16x128xf32>
    %90 = arith.ori %87, %89 : vector<16x128xi1>
    %91 = arith.select %90, %0, %82 : vector<16x128xi1>, vector<16x128xf32>
    %92 = arith.select %90, %1, %85 : vector<16x128xi1>, vector<16x128xf32>
    %c0_64 = arith.constant 0 : index
    %c0_65 = arith.constant 0 : index
    %93 = vector.load %arg3[%c0_64, %c0_65] : memref<16x16xbf16, #tpu.memory_space<vmem>>, vector<16x16xbf16>
    %c0_66 = arith.constant 0 : index
    %c0_67 = arith.constant 0 : index
    %94 = vector.load %arg4[%c0_66, %c0_67] : memref<16x16xbf16, #tpu.memory_space<vmem>>, vector<16x16xbf16>
    %cst_68 = arith.constant dense<0.000000e+00> : vector<16x128xf32>
    %95 = tpu.matmul %93, %91, %cst_68 {dimension_numbers = #tpu.dot_dimension_numbers<[1], [0], [0], [1], [0, 0, 1, 1], [], []>} : vector<16x16xbf16>, vector<16x128xf32>, vector<16x128xf32> -> vector<16x128xf32>
    %cst_69 = arith.constant dense<0.000000e+00> : vector<16x128xf32>
    %96 = tpu.matmul %94, %92, %cst_69 {dimension_numbers = #tpu.dot_dimension_numbers<[1], [0], [0], [1], [0, 0, 1, 1], [], []>} : vector<16x16xbf16>, vector<16x128xf32>, vector<16x128xf32> -> vector<16x128xf32>
    %97 = arith.subf %95, %96 : vector<16x128xf32>
    %cst_70 = arith.constant dense<0.000000e+00> : vector<16x128xf32>
    %98 = tpu.matmul %93, %92, %cst_70 {dimension_numbers = #tpu.dot_dimension_numbers<[1], [0], [0], [1], [0, 0, 1, 1], [], []>} : vector<16x16xbf16>, vector<16x128xf32>, vector<16x128xf32> -> vector<16x128xf32>
    %cst_71 = arith.constant dense<0.000000e+00> : vector<16x128xf32>
    %99 = tpu.matmul %94, %91, %cst_71 {dimension_numbers = #tpu.dot_dimension_numbers<[1], [0], [0], [1], [0, 0, 1, 1], [], []>} : vector<16x16xbf16>, vector<16x128xf32>, vector<16x128xf32> -> vector<16x128xf32>
    %100 = arith.addf %98, %99 : vector<16x128xf32>
    %c0_72 = arith.constant 0 : index
    %c0_73 = arith.constant 0 : index
    %101 = vector.load %arg19[%c0_72, %c0_73] : memref<128x128xbf16, #tpu.memory_space<vmem>>, vector<128x128xbf16>
    %c0_74 = arith.constant 0 : index
    %c0_75 = arith.constant 0 : index
    %102 = vector.load %arg20[%c0_74, %c0_75] : memref<128x128xbf16, #tpu.memory_space<vmem>>, vector<128x128xbf16>
    %cst_76 = arith.constant dense<0.000000e+00> : vector<16x128xf32>
    %103 = tpu.matmul %97, %101, %cst_76 {dimension_numbers = #tpu.dot_dimension_numbers<[1], [0], [0], [1], [0, 0, 1, 1], [], []>} : vector<16x128xf32>, vector<128x128xbf16>, vector<16x128xf32> -> vector<16x128xf32>
    %cst_77 = arith.constant dense<0.000000e+00> : vector<16x128xf32>
    %104 = tpu.matmul %100, %102, %cst_77 {dimension_numbers = #tpu.dot_dimension_numbers<[1], [0], [0], [1], [0, 0, 1, 1], [], []>} : vector<16x128xf32>, vector<128x128xbf16>, vector<16x128xf32> -> vector<16x128xf32>
    %105 = arith.subf %103, %104 : vector<16x128xf32>
    %cst_78 = arith.constant dense<0.000000e+00> : vector<16x128xf32>
    %106 = tpu.matmul %97, %102, %cst_78 {dimension_numbers = #tpu.dot_dimension_numbers<[1], [0], [0], [1], [0, 0, 1, 1], [], []>} : vector<16x128xf32>, vector<128x128xbf16>, vector<16x128xf32> -> vector<16x128xf32>
    %cst_79 = arith.constant dense<0.000000e+00> : vector<16x128xf32>
    %107 = tpu.matmul %100, %101, %cst_79 {dimension_numbers = #tpu.dot_dimension_numbers<[1], [0], [0], [1], [0, 0, 1, 1], [], []>} : vector<16x128xf32>, vector<128x128xbf16>, vector<16x128xf32> -> vector<16x128xf32>
    %108 = arith.addf %106, %107 : vector<16x128xf32>
    %c0_80 = arith.constant 0 : index
    %c0_81 = arith.constant 0 : index
    %109 = vector.load %arg21[%c0_80, %c0_81] : memref<16x128xf32, #tpu.memory_space<vmem>>, vector<16x128xf32>
    tpu.vector_store %arg21[%c0_80, %c0_81], %105 {strides = array<i32>} : memref<16x128xf32, #tpu.memory_space<vmem>>, vector<16x128xf32>,
    %c0_82 = arith.constant 0 : index
    %c0_83 = arith.constant 0 : index
    %110 = vector.load %arg22[%c0_82, %c0_83] : memref<16x128xf32, #tpu.memory_space<vmem>>, vector<16x128xf32>
    tpu.vector_store %arg22[%c0_82, %c0_83], %108 {strides = array<i32>} : memref<16x128xf32, #tpu.memory_space<vmem>>, vector<16x128xf32>,
    return
  }
  func.func @transform_0(%arg0: i32) -> (i32, i32) {
    %c0_i32 = arith.constant 0 : i32
    %c0_i32_0 = arith.constant 0 : i32
    return %c0_i32, %arg0 : i32, i32
  }
  func.func @transform_1(%arg0: i32) -> (i32, i32) {
    %c0_i32 = arith.constant 0 : i32
    %c0_i32_0 = arith.constant 0 : i32
    return %c0_i32, %arg0 : i32, i32
  }
  func.func @transform_2(%arg0: i32) -> (i32, i32) {
    %c0_i32 = arith.constant 0 : i32
    %c0_i32_0 = arith.constant 0 : i32
    %c0_i32_1 = arith.constant 0 : i32
    return %c0_i32, %c0_i32_0 : i32, i32
  }
  func.func @transform_3(%arg0: i32) -> (i32, i32) {
    %c0_i32 = arith.constant 0 : i32
    %c0_i32_0 = arith.constant 0 : i32
    %c0_i32_1 = arith.constant 0 : i32
    return %c0_i32, %c0_i32_0 : i32, i32
  }
  func.func @transform_4(%arg0: i32) -> (i32, i32) {
    %c0_i32 = arith.constant 0 : i32
    %c0_i32_0 = arith.constant 0 : i32
    %c0_i32_1 = arith.constant 0 : i32
    return %c0_i32, %c0_i32_0 : i32, i32
  }
  func.func @transform_5(%arg0: i32) -> (i32, i32) {
    %c0_i32 = arith.constant 0 : i32
    %c0_i32_0 = arith.constant 0 : i32
    %c0_i32_1 = arith.constant 0 : i32
    return %c0_i32, %c0_i32_0 : i32, i32
  }
  func.func @transform_6(%arg0: i32) -> (i32, i32) {
    %c0_i32 = arith.constant 0 : i32
    %c0_i32_0 = arith.constant 0 : i32
    %c0_i32_1 = arith.constant 0 : i32
    return %c0_i32, %c0_i32_0 : i32, i32
  }
  func.func @transform_7(%arg0: i32) -> (i32, i32) {
    %c0_i32 = arith.constant 0 : i32
    %c0_i32_0 = arith.constant 0 : i32
    %c0_i32_1 = arith.constant 0 : i32
    return %c0_i32, %c0_i32_0 : i32, i32
  }
  func.func @transform_8(%arg0: i32) -> (i32, i32) {
    %c0_i32 = arith.constant 0 : i32
    %c0_i32_0 = arith.constant 0 : i32
    %c0_i32_1 = arith.constant 0 : i32
    return %c0_i32, %c0_i32_0 : i32, i32
  }
  func.func @transform_9(%arg0: i32) -> (i32, i32) {
    %c0_i32 = arith.constant 0 : i32
    %c0_i32_0 = arith.constant 0 : i32
    %c0_i32_1 = arith.constant 0 : i32
    return %c0_i32, %c0_i32_0 : i32, i32
  }
  func.func @transform_10(%arg0: i32) -> (i32, i32) {
    %c0_i32 = arith.constant 0 : i32
    %c0_i32_0 = arith.constant 0 : i32
    %c0_i32_1 = arith.constant 0 : i32
    return %c0_i32, %c0_i32_0 : i32, i32
  }
  func.func @transform_11(%arg0: i32) -> (i32, i32) {
    %c0_i32 = arith.constant 0 : i32
    %c0_i32_0 = arith.constant 0 : i32
    %c0_i32_1 = arith.constant 0 : i32
    return %c0_i32, %c0_i32_0 : i32, i32
  }
  func.func @transform_12(%arg0: i32) -> (i32, i32) {
    %c0_i32 = arith.constant 0 : i32
    %c0_i32_0 = arith.constant 0 : i32
    %c0_i32_1 = arith.constant 0 : i32
    return %c0_i32, %c0_i32_0 : i32, i32
  }
  func.func @transform_13(%arg0: i32) -> (i32, i32) {
    %c0_i32 = arith.constant 0 : i32
    %c0_i32_0 = arith.constant 0 : i32
    %c0_i32_1 = arith.constant 0 : i32
    return %c0_i32, %c0_i32_0 : i32, i32
  }
  func.func @transform_14(%arg0: i32) -> (i32, i32) {
    %c0_i32 = arith.constant 0 : i32
    %c0_i32_0 = arith.constant 0 : i32
    %c0_i32_1 = arith.constant 0 : i32
    return %c0_i32, %c0_i32_0 : i32, i32
  }
  func.func @transform_15(%arg0: i32) -> (i32, i32) {
    %c0_i32 = arith.constant 0 : i32
    %c0_i32_0 = arith.constant 0 : i32
    %c0_i32_1 = arith.constant 0 : i32
    return %c0_i32, %c0_i32_0 : i32, i32
  }
  func.func @transform_16(%arg0: i32) -> (i32, i32) {
    %c0_i32 = arith.constant 0 : i32
    %c0_i32_0 = arith.constant 0 : i32
    %c0_i32_1 = arith.constant 0 : i32
    return %c0_i32, %c0_i32_0 : i32, i32
  }
  func.func @transform_17(%arg0: i32) -> (i32, i32) {
    %c0_i32 = arith.constant 0 : i32
    %c0_i32_0 = arith.constant 0 : i32
    %c0_i32_1 = arith.constant 0 : i32
    return %c0_i32, %c0_i32_0 : i32, i32
  }
  func.func @transform_18(%arg0: i32) -> (i32, i32) {
    %c0_i32 = arith.constant 0 : i32
    %c0_i32_0 = arith.constant 0 : i32
    %c0_i32_1 = arith.constant 0 : i32
    return %c0_i32, %c0_i32_0 : i32, i32
  }
  func.func @transform_19(%arg0: i32) -> (i32, i32) {
    %c0_i32 = arith.constant 0 : i32
    %c0_i32_0 = arith.constant 0 : i32
    %c0_i32_1 = arith.constant 0 : i32
    return %c0_i32, %c0_i32_0 : i32, i32
  }
  func.func @transform_20(%arg0: i32) -> (i32, i32) {
    %c0_i32 = arith.constant 0 : i32
    %c0_i32_0 = arith.constant 0 : i32
    return %c0_i32, %arg0 : i32, i32
  }
  func.func @transform_21(%arg0: i32) -> (i32, i32) {
    %c0_i32 = arith.constant 0 : i32
    %c0_i32_0 = arith.constant 0 : i32
    return %c0_i32, %arg0 : i32, i32
  }
}

</mosaic_0001>

<bundles_post_ra>
// kernel: paft_dc_forward.1
= control target key start
LH: loop header
LB: loop body
LE: loop exit
PB: predicated region body
PF: predicated region fallthrough
CT: control target
= control target key end

     0   :  { %v4798_v0 = vmov 0.0|0.0   ;;  %vm3617_vm0 = vmmov 0   ;;  %v4796_v4 = vmov 0.0   ;;  %vm81_vm1 = vcmask 130048   ;;  %s4768_s0 = inlined_call_operand.vmem [shape: f32[16,128], index: 0, kind: input, shape index: {}]   ;;  %s4769_s2 = inlined_call_operand.vmem [shape: bf16[16,16], index: 2, kind: input, shape index: {}]   ;;  %s4770_s3 = inlined_call_operand.vmem [shape: bf16[16,16], index: 3, kind: input, shape index: {}]   ;;  %s4771_s1 = inlined_call_operand.vmem [shape: f32[16,128], index: 1, kind: input, shape index: {}]   ;;  %s4772_s6 = inlined_call_operand.vmem [shape: bf16[128,256], index: 6, kind: input, shape index: {}]   ;;  %s4773_s7 = inlined_call_operand.vmem [shape: bf16[128,256], index: 7, kind: input, shape index: {}]   ;;  %s4774_s10 = inlined_call_operand.vmem [shape: bf16[256,256], index: 10, kind: input, shape index: {}]   ;;  %s4775_s11 = inlined_call_operand.vmem [shape: bf16[256,256], index: 11, kind: input, shape index: {}]   ;;  %s4776_s8 = inlined_call_operand.vmem [shape: bf16[1,256], index: 8, kind: input, shape index: {}]   ;;  %s4777_s9 = inlined_call_operand.vmem [shape: bf16[1,256], index: 9, kind: input, shape index: {}]   ;;  %s4778_s14 = inlined_call_operand.vmem [shape: bf16[256,128], index: 14, kind: input, shape index: {}]   ;;  %s4779_s15 = inlined_call_operand.vmem [shape: bf16[256,128], index: 15, kind: input, shape index: {}]   ;;  %s4780_s12 = inlined_call_operand.vmem [shape: bf16[1,256], index: 12, kind: input, shape index: {}]   ;;  %s4781_s13 = inlined_call_operand.vmem [shape: bf16[1,256], index: 13, kind: input, shape index: {}]   ;;  %s4782_s5 = inlined_call_operand.vmem [shape: bf16[16,16], index: 5, kind: input, shape index: {}]   ;;  %s4783_s4 = inlined_call_operand.vmem [shape: bf16[16,16], index: 4, kind: input, shape index: {}]   ;;  %s4784_s16 = inlined_call_operand.vmem [shape: bf16[1,128], index: 16, kind: input, shape index: {}]   ;;  %s4785_s17 = inlined_call_operand.vmem [shape: bf16[1,128], index: 17, kind: input, shape index: {}]   ;;  %s4786_s18 = inlined_call_operand.vmem [shape: bf16[128,128], index: 18, kind: input, shape index: {}]   ;;  %s4787_s19 = inlined_call_operand.vmem [shape: bf16[128,128], index: 19, kind: input, shape index: {}]   ;;  %s4788_s20 = inlined_call_operand.vmem [shape: f32[16,128], index: 20, kind: output, shape index: {0}]   ;;  %s4789_s21 = inlined_call_operand.vmem [shape: f32[16,128], index: 21, kind: output, shape index: {1}]  }
   0x1   :  { %4831 = sst [smem:[#allocation31_spill]] %s4768_s0  ;;  %3353 = vmatprep.subr.bf16.mxu1 %v4798_v0  ;;  %3359 = vmatprep.subr.bf16.mxu0 %v4798_v0  ;;  %v3874_v56 = vld [vmem:[%s4774_s10 + $0x4] ss:$8 sps:$4 sm:$0xff]   ;;  %v3884_v58 = vld [vmem:[%s4774_s10] ss:$8 sps:$4 sm:$0xff]  }
   0x2   :  { %4832 = sst [smem:[#allocation32_spill]] %s4769_s2  ;;  %s4837_s26 = sld [smem:[#allocation31_spill]]  ;;  %3185 = vmatprep.mubr.msk.bf16.mxu1 %vm3617_vm0, %v4796_v4  ;;  %3201 = vmatprep.mubr.msk.bf16.mxu0 %vm3617_vm0, %v4796_v4  ;;  %v3879_v57 = vld [vmem:[%s4775_s11 + $0x4] ss:$8 sps:$4 sm:$0xff]   ;;  %v3890_v59 = vld [vmem:[%s4774_s10 + $0x14] ss:$8 sps:$4 sm:$0xff]  }
   0x3   :  { %4833 = sst [smem:[#allocation33_spill]] %s4770_s3  ;;  %s4838_s0 = sld [smem:[#allocation32_spill]]  ;;  %v3895_v60 = vld [vmem:[%s4775_s11] ss:$8 sps:$4 sm:$0xff]   ;;  %v3901_v61 = vld [vmem:[%s4775_s11 + $0x14] ss:$8 sps:$4 sm:$0xff]  }
   0x4   :  { %4834 = sst [smem:[#allocation34_spill]] %s4771_s1  ;;  %v3908_v62 = vld [vmem:[%s4774_s10 + $0x10] ss:$8 sps:$4 sm:$0xff]   ;;  %v3915_v63 = vld [vmem:[%s4774_s10 + $0x24] ss:$8 sps:$4 sm:$0xff]  }
   0x5   :  { %4835 = sst [smem:[#allocation35_spill]] %s4772_s6  ;;  %s4840_s2 = sld [smem:[#allocation34_spill]] }
   0x6   :  { %4836 = sst [smem:[#allocation36_spill]] %s4773_s7  ;;  %s4839_s7 = sld [smem:[#allocation33_spill]] }
   0x7   :  { %s4841_s1 = sld [smem:[#allocation35_spill]]  ;;  %s4842_s6 = sld [smem:[#allocation36_spill]] }
   0x8   :  { %v68_v1 = vld [vmem:[%s4837_s26] sm:$0xff]  ;;  %v69_v2 = vld [vmem:[%s4837_s26 + $0x8] sm:$0xff] }
   0x9   :  { %v3354_v3 = vpack.c.bf16 %v69_v2, %v68_v1  ;;  %v3414_v5 = vld [vmem:[%s4838_s0] sm:$0xff]   ;;  %v3922_v1 = vld [vmem:[%s4775_s11 + $0x10] ss:$8 sps:$4 sm:$0xff]  }
   0xa   :  { %v3928_v2 = vld [vmem:[%s4775_s11 + $0x24] ss:$8 sps:$4 sm:$0xff]  }
   0xb   :  { %v70_v7 = vld [vmem:[%s4840_s2] sm:$0xff]  ;;  %3355 = vmatpush3.bf16.msra.mxu1 %v3354_v3  ;;  %3361 = vmatpush3.bf16.msra.mxu0 %v3354_v3  ;;  %v71_v8 = vld [vmem:[%s4840_s2 + $0x8] sm:$0xff] }
   0xc   :  { %v3415_v6 = vld [vmem:[%s4839_s7] sm:$0xff]   ;;  %3356 = vmatprep.subr.bf16.mxu1 %v4798_v0  ;;  %v3357_v9 = vpack.c.bf16 %v71_v8, %v70_v7  ;;  %3362 = vmatprep.subr.bf16.mxu0 %v4798_v0  ;;  %v3953_v7 = vld [vmem:[%s4775_s11 + $0x34] ss:$8 sps:$4 sm:$0xff]   ;;  %v3959_v8 = vld [vmem:[%s4774_s10 + $0x30] ss:$8 sps:$4 sm:$0xff]  }
   0xd   :  { %v3418_v10 = vld [vmem:[%s4841_s1 + $0x4] ss:$8 sps:$4 sm:$0xff]   ;;  %v3416_v11 = vld [vmem:[%s4841_s1] ss:$8 sps:$4 sm:$0xff]   ;;  %v3421_v12 = vld [vmem:[%s4841_s1 + $0x14] ss:$8 sps:$4 sm:$0xff]  }
   0xe   :  { %3186 = vmatmul.mubr.msk.bf16.vlgmr.msra.gmra.mrb[0].mxu1 %vm81_vm1, %v3414_v5  ;;  %3202 = vmatmul.mubr.msk.bf16.vlgmr.msra.gmra.mrb[0].mxu0 %vm81_vm1, %v3415_v6  ;;  %v3419_v13 = vld [vmem:[%s4841_s1 + $0x10] ss:$8 sps:$4 sm:$0xff]   ;;  %v3424_v14 = vld [vmem:[%s4841_s1 + $0x24] ss:$8 sps:$4 sm:$0xff]   ;;  %v3422_v15 = vld [vmem:[%s4841_s1 + $0x20] ss:$8 sps:$4 sm:$0xff]  }
   0xf   :  { %3358 = vmatpush3.bf16.msra.mxu1 %v3357_v9  ;;  %3193 = vmatprep.mubr.msk.bf16.mxu1 %vm3617_vm0, %v4796_v4  ;;  %v3427_v16 = vld [vmem:[%s4841_s1 + $0x34] ss:$8 sps:$4 sm:$0xff]   ;;  %v3425_v17 = vld [vmem:[%s4841_s1 + $0x30] ss:$8 sps:$4 sm:$0xff]   ;;  %v3430_v18 = vld [vmem:[%s4841_s1 + $0x44] ss:$8 sps:$4 sm:$0xff]  }
  0x10   :  { %3364 = vmatpush3.bf16.msra.mxu0 %v3357_v9  ;;  %3209 = vmatprep.mubr.msk.bf16.mxu0 %vm3617_vm0, %v4796_v4  ;;  %v3428_v19 = vld [vmem:[%s4841_s1 + $0x40] ss:$8 sps:$4 sm:$0xff]   ;;  %v3433_v20 = vld [vmem:[%s4841_s1 + $0x54] ss:$8 sps:$4 sm:$0xff]   ;;  %v3431_v21 = vld [vmem:[%s4841_s1 + $0x50] ss:$8 sps:$4 sm:$0xff]  }
  0x11   :  { %499 = vmatprep.subr.bf16.mxu0 %v3418_v10  ;;  %673 = vmatprep.subr.bf16.mxu1 %v3418_v10  ;;  %v3436_v22 = vld [vmem:[%s4841_s1 + $0x64] ss:$8 sps:$4 sm:$0xff]   ;;  %v3434_v23 = vld [vmem:[%s4841_s1 + $0x60] ss:$8 sps:$4 sm:$0xff]   ;;  %v3437_v24 = vld [vmem:[%s4841_s1 + $0x70] ss:$8 sps:$4 sm:$0xff]  }
  0x12   :  { %v3439_v25 = vld [vmem:[%s4841_s1 + $0x74] ss:$8 sps:$4 sm:$0xff]   ;;  %v3442_v26 = vld [vmem:[%s4842_s6 + $0x4] ss:$8 sps:$4 sm:$0xff]   ;;  %v3440_v32 = vld [vmem:[%s4842_s6] ss:$8 sps:$4 sm:$0xff]  }
  0x13   :  { %v3445_v35 = vld [vmem:[%s4842_s6 + $0x14] ss:$8 sps:$4 sm:$0xff]   ;;  %v3443_v40 = vld [vmem:[%s4842_s6 + $0x10] ss:$8 sps:$4 sm:$0xff]   ;;  %v3448_v41 = vld [vmem:[%s4842_s6 + $0x24] ss:$8 sps:$4 sm:$0xff]  }
  0x14   :  { %v3446_v45 = vld [vmem:[%s4842_s6 + $0x20] ss:$8 sps:$4 sm:$0xff]   ;;  %v3451_v46 = vld [vmem:[%s4842_s6 + $0x34] ss:$8 sps:$4 sm:$0xff]   ;;  %v3449_v47 = vld [vmem:[%s4842_s6 + $0x30] ss:$8 sps:$4 sm:$0xff]  }
  0x15   :  { %v3454_v48 = vld [vmem:[%s4842_s6 + $0x44] ss:$8 sps:$4 sm:$0xff]   ;;  %v3452_v49 = vld [vmem:[%s4842_s6 + $0x40] ss:$8 sps:$4 sm:$0xff]   ;;  %v3457_v50 = vld [vmem:[%s4842_s6 + $0x54] ss:$8 sps:$4 sm:$0xff]  }
  0x16   :  { %3194 = vmatmul.mubr.msk.bf16.vlgmr.msra.gmra.mrb[4].mxu1 %vm81_vm1, %v3415_v6  ;;  %v3455_v51 = vld [vmem:[%s4842_s6 + $0x50] ss:$8 sps:$4 sm:$0xff]   ;;  %v3460_v52 = vld [vmem:[%s4842_s6 + $0x64] ss:$8 sps:$4 sm:$0xff]   ;;  %v3458_v53 = vld [vmem:[%s4842_s6 + $0x60] ss:$8 sps:$4 sm:$0xff]  }
  0x17   :  { %674 = vmatpush1.bf16.msra.mxu1 %v3416_v11  ;;  %705 = vmatprep.mubr.f32.mxu1 %v4796_v4  ;;  %v3463_v54 = vld [vmem:[%s4842_s6 + $0x74] ss:$8 sps:$4 sm:$0xff]   ;;  %v3461_v55 = vld [vmem:[%s4842_s6 + $0x70] ss:$8 sps:$4 sm:$0xff]   ;;  %v3934_v3 = vld [vmem:[%s4774_s10 + $0x20] ss:$8 sps:$4 sm:$0xff]  }
  0x18   :  { %675 = vmatprep.subr.bf16.mxu1 %v3421_v12  ;;  %v3947_v6 = vld [vmem:[%s4775_s11 + $0x20] ss:$8 sps:$4 sm:$0xff]   ;;  %4844 = vst [vmem:[#allocation3_spill] sm:$0xff] %v3953_v7  ;;  %v3965_v9 = vld [vmem:[%s4774_s10 + $0x44] ss:$8 sps:$4 sm:$0xff]  }
  0x19   :  { %4843 = vst [vmem:[#allocation2_spill] sm:$0xff] %v3947_v6  ;;  %v3971_v10 = vld [vmem:[%s4775_s11 + $0x30] ss:$8 sps:$4 sm:$0xff]  }
  0x1a   :  { %3210 = vmatmul.mubr.msk.bf16.vlgmr.msra.gmra.mrb[0].mxu0 %vm81_vm1, %v3414_v5  ;;  %v3941_v5 = vld [vmem:[%s4774_s10 + $0x34] ss:$8 sps:$4 sm:$0xff]   ;;  %4845 = vst [vmem:[#allocation4_spill] sm:$0xff] %v3971_v10  ;;  %v4254_v0 = vld [vmem:[%s4775_s11 + $0xf0] ss:$8 sps:$4 sm:$0xff]  }
  0x1b   :  { %500 = vmatpush1.bf16.msra.mxu0 %v3416_v11  ;;  %676 = vmatpush1.bf16.msra.mxu1 %v3419_v13  ;;  %v3977_v11 = vld [vmem:[%s4775_s11 + $0x44] ss:$8 sps:$4 sm:$0xff]   ;;  %4869 = vst [vmem:[#allocation28_spill] sm:$0xff] %v4254_v0 }
  0x1c   :  { %501 = vmatprep.subr.bf16.mxu0 %v3421_v12  ;;  %677 = vmatprep.subr.bf16.mxu1 %v3424_v14  ;;  %4846 = vst [vmem:[#allocation5_spill] sm:$0xff] %v3977_v11  ;;  %v3983_v12 = vld [vmem:[%s4774_s10 + $0x40] ss:$8 sps:$4 sm:$0xff]  }
  0x1d   :  { %531 = vmatprep.mubr.f32.mxu0 %v4796_v4 }
  0x1f   :  { %502 = vmatpush1.bf16.msra.mxu0 %v3419_v13  ;;  %678 = vmatpush1.bf16.msra.mxu1 %v3422_v15  ;;  %v3989_v13 = vld [vmem:[%s4774_s10 + $0x54] ss:$8 sps:$4 sm:$0xff]  }
  0x20   :  { %503 = vmatprep.subr.bf16.mxu0 %v3424_v14  ;;  %679 = vmatprep.subr.bf16.mxu1 %v3427_v16  ;;  %v3995_v14 = vld [vmem:[%s4775_s11 + $0x40] ss:$8 sps:$4 sm:$0xff]  }
  0x21   :  { %4847 = vst [vmem:[#allocation6_spill] sm:$0xff] %v3995_v14 }
  0x23   :  { %504 = vmatpush1.bf16.msra.mxu0 %v3422_v15  ;;  %680 = vmatpush1.bf16.msra.mxu1 %v3425_v17  ;;  %v4001_v15 = vld [vmem:[%s4775_s11 + $0x54] ss:$8 sps:$4 sm:$0xff]  }
  0x24   :  { %505 = vmatprep.subr.bf16.mxu0 %v3427_v16  ;;  %681 = vmatprep.subr.bf16.mxu1 %v3430_v18  ;;  %4848 = vst [vmem:[#allocation7_spill] sm:$0xff] %v4001_v15  ;;  %v4007_v16 = vld [vmem:[%s4774_s10 + $0x50] ss:$8 sps:$4 sm:$0xff]  }
  0x27   :  { %506 = vmatpush1.bf16.msra.mxu0 %v3425_v17  ;;  %682 = vmatpush1.bf16.msra.mxu1 %v3428_v19  ;;  %v4014_v17 = vld [vmem:[%s4775_s11 + $0x50] ss:$8 sps:$4 sm:$0xff]  }
  0x28   :  { %507 = vmatprep.subr.bf16.mxu0 %v3430_v18  ;;  %683 = vmatprep.subr.bf16.mxu1 %v3433_v20  ;;  %4849 = vst [vmem:[#allocation8_spill] sm:$0xff] %v4014_v17  ;;  %v4022_v18 = vld [vmem:[%s4774_s10 + $0x64] ss:$8 sps:$4 sm:$0xff]  }
  0x2b   :  { %508 = vmatpush1.bf16.msra.mxu0 %v3428_v19  ;;  %684 = vmatpush1.bf16.msra.mxu1 %v3431_v21  ;;  %v4027_v19 = vld [vmem:[%s4774_s10 + $0x60] ss:$8 sps:$4 sm:$0xff]  }
  0x2c   :  { %509 = vmatprep.subr.bf16.mxu0 %v3433_v20  ;;  %685 = vmatprep.subr.bf16.mxu1 %v3436_v22  ;;  %v4032_v20 = vld [vmem:[%s4775_s11 + $0x64] ss:$8 sps:$4 sm:$0xff]  }
  0x2d   :  { %4850 = vst [vmem:[#allocation9_spill] sm:$0xff] %v4032_v20 }
  0x2f   :  { %510 = vmatpush1.bf16.msra.mxu0 %v3431_v21  ;;  %686 = vmatpush1.bf16.msra.mxu1 %v3434_v23  ;;  %v4038_v21 = vld [vmem:[%s4775_s11 + $0x60] ss:$8 sps:$4 sm:$0xff]  }
  0x30   :  { %511 = vmatprep.subr.bf16.mxu0 %v3436_v22  ;;  %687 = vmatprep.subr.bf16.mxu1 %v3439_v25  ;;  %4851 = vst [vmem:[#allocation10_spill] sm:$0xff] %v4038_v21  ;;  %v4046_v22 = vld [vmem:[%s4774_s10 + $0x74] ss:$8 sps:$4 sm:$0xff]  }
  0x33   :  { %512 = vmatpush1.bf16.msra.mxu0 %v3434_v23  ;;  %688 = vmatpush1.bf16.msra.mxu1 %v3437_v24  ;;  %v4051_v23 = vld [vmem:[%s4774_s10 + $0x70] ss:$8 sps:$4 sm:$0xff]  }
  0x34   :  { %513 = vmatprep.subr.bf16.mxu0 %v3439_v25  ;;  %718 = vmatprep.subr.bf16.mxu1 %v3442_v26  ;;  %v4062_v25 = vld [vmem:[%s4775_s11 + $0x70] ss:$8 sps:$4 sm:$0xff]  }
  0x35   :  { %4853 = vst [vmem:[#allocation12_spill] sm:$0xff] %v4062_v25 }
  0x37   :  { %514 = vmatpush1.bf16.msra.mxu0 %v3437_v24  ;;  %v4056_v24 = vld [vmem:[%s4775_s11 + $0x74] ss:$8 sps:$4 sm:$0xff]  }
  0x38   :  { %624 = vmatprep.subr.bf16.mxu0 %v3442_v26  ;;  %4852 = vst [vmem:[#allocation11_spill] sm:$0xff] %v4056_v24  ;;  %v4067_v26 = vld [vmem:[%s4774_s10 + $0x84] ss:$8 sps:$4 sm:$0xff]  }
  0xe1   :  { %v151_v27 = vpop.f32.mrb[0].mxu1 }
  0xe2   :  { %v3187_v28 = vpop.f32.mrb[1].mxu1 }
  0xe3   :  { %v154_v29 = vpop.f32.mrb[2].mxu1  ;;  %v4079_v28 = vld [vmem:[%s4775_s11 + $0x84] ss:$8 sps:$4 sm:$0xff]  }
  0xe4   :  { %v3188_v30 = vpop.f32.mrb[3].mxu1  ;;  %4854 = vst [vmem:[#allocation13_spill] sm:$0xff] %v4079_v28 }
  0xe5   :  { %v4091_v30 = vld [vmem:[%s4774_s10 + $0x94] ss:$8 sps:$4 sm:$0xff]  }
  0xe9   :  { %v232_v31 = vpop.f32.mrb[4].mxu1 }
  0xea   :  { %v3819_v33 = vsub.f32 %v151_v27, %v232_v31  ;;  %v3195_v34 = vpop.f32.mrb[5].mxu1  ;;  %v4074_v27 = vld [vmem:[%s4774_s10 + $0x80] ss:$8 sps:$4 sm:$0xff]   ;;  %v4097_v31 = vld [vmem:[%s4775_s11 + $0x94] ss:$8 sps:$4 sm:$0xff]  }
  0xeb   :  { %v235_v36 = vpop.f32.mrb[6].mxu1  ;;  %4856 = vst [vmem:[#allocation15_spill] sm:$0xff] %v4097_v31  ;;  %v4115_v34 = vld [vmem:[%s4774_s10 + $0xa4] ss:$8 sps:$4 sm:$0xff]  }
  0xec   :  { %v3824_v37 = vsub.f32 %v154_v29, %v235_v36  ;;  %v3196_v38 = vpop.f32.mrb[7].mxu1  ;;  %532 = vmatmul.mubr.f32.vlgmr.msra.gmra.mrb[4].mxu0 %v3819_v33  ;;  %v4086_v29 = vld [vmem:[%s4775_s11 + $0x80] ss:$8 sps:$4 sm:$0xff]  }
  0xed   :  { %625 = vmatpush1.bf16.msra.mxu0 %v3440_v32  ;;  %v380_v39 = vpop.f32.mrb[0].mxu0  ;;  %537 = vmatprep.mubr.f32.mxu0 %v4796_v4  ;;  %4855 = vst [vmem:[#allocation14_spill] sm:$0xff] %v4086_v29  ;;  %v4127_v36 = vld [vmem:[%s4774_s10 + $0xa0] ss:$8 sps:$4 sm:$0xff]   ;;  %v4139_v38 = vld [vmem:[%s4774_s10 + $0xb4] ss:$8 sps:$4 sm:$0xff]  }
  0xee   :  { %706 = vmatmul.mubr.f32.vlgmr.msra.gmra.mrb[8].mxu1 %v380_v39  ;;  %626 = vmatprep.subr.bf16.mxu0 %v3445_v35  ;;  %v3211_v42 = vpop.f32.mrb[1].mxu0 }
  0xef   :  { %719 = vmatpush1.bf16.msra.mxu1 %v3440_v32  ;;  %v383_v43 = vpop.f32.mrb[2].mxu0  ;;  %711 = vmatprep.mubr.f32.mxu1 %v4796_v4  ;;  %v4103_v32 = vld [vmem:[%s4774_s10 + $0x90] ss:$8 sps:$4 sm:$0xff]   ;;  %v4163_v42 = vld [vmem:[%s4774_s10 + $0xc4] ss:$8 sps:$4 sm:$0xff]  }
  0xf0   :  { %538 = vmatmul.mubr.f32.gmra.mrb[6].mxu0 %v3824_v37  ;;  %720 = vmatprep.subr.bf16.mxu1 %v3445_v35  ;;  %v3212_v44 = vpop.f32.mrb[3].mxu0  ;;  %v4121_v35 = vld [vmem:[%s4775_s11 + $0xa4] ss:$8 sps:$4 sm:$0xff]  }
  0xf1   :  { %627 = vmatpush1.bf16.msra.mxu0 %v3443_v40  ;;  %656 = vmatprep.mubr.f32.mxu0 %v4796_v4  ;;  %4858 = vst [vmem:[#allocation17_spill] sm:$0xff] %v4121_v35  ;;  %v4175_v44 = vld [vmem:[%s4774_s10 + $0xc0] ss:$8 sps:$4 sm:$0xff]  }
  0xf2   :  { %628 = vmatprep.subr.bf16.mxu0 %v3448_v41  ;;  %712 = vmatmul.mubr.f32.gmra.mrb[10].mxu1 %v383_v43 }
  0xf3   :  { %721 = vmatpush1.bf16.msra.mxu1 %v3443_v40  ;;  %750 = vmatprep.mubr.f32.mxu1 %v4796_v4  ;;  %v4151_v40 = vld [vmem:[%s4774_s10 + $0xb0] ss:$8 sps:$4 sm:$0xff]  }
  0xf4   :  { %722 = vmatprep.subr.bf16.mxu1 %v3448_v41  ;;  %v4158_v41 = vld [vmem:[%s4775_s11 + $0xb0] ss:$8 sps:$4 sm:$0xff]  }
  0xf5   :  { %629 = vmatpush1.bf16.msra.mxu0 %v3446_v45  ;;  %4861 = vst [vmem:[#allocation20_spill] sm:$0xff] %v4158_v41 }
  0xf6   :  { %630 = vmatprep.subr.bf16.mxu0 %v3451_v46 }
  0xf7   :  { %723 = vmatpush1.bf16.msra.mxu1 %v3446_v45  ;;  %v4182_v45 = vld [vmem:[%s4775_s11 + $0xc0] ss:$8 sps:$4 sm:$0xff]  }
  0xf8   :  { %724 = vmatprep.subr.bf16.mxu1 %v3451_v46  ;;  %4863 = vst [vmem:[#allocation22_spill] sm:$0xff] %v4182_v45  ;;  %v4187_v46 = vld [vmem:[%s4774_s10 + $0xd4] ss:$8 sps:$4 sm:$0xff]  }
  0xf9   :  { %631 = vmatpush1.bf16.msra.mxu0 %v3449_v47 }
  0xfa   :  { %632 = vmatprep.subr.bf16.mxu0 %v3454_v48 }
  0xfb   :  { %725 = vmatpush1.bf16.msra.mxu1 %v3449_v47  ;;  %v4193_v47 = vld [vmem:[%s4775_s11 + $0xd4] ss:$8 sps:$4 sm:$0xff]  }
  0xfc   :  { %726 = vmatprep.subr.bf16.mxu1 %v3454_v48  ;;  %4864 = vst [vmem:[#allocation23_spill] sm:$0xff] %v4193_v47  ;;  %v4199_v48 = vld [vmem:[%s4774_s10 + $0xd0] ss:$8 sps:$4 sm:$0xff]  }
  0xfd   :  { %633 = vmatpush1.bf16.msra.mxu0 %v3452_v49 }
  0xfe   :  { %634 = vmatprep.subr.bf16.mxu0 %v3457_v50 }
  0xff   :  { %727 = vmatpush1.bf16.msra.mxu1 %v3452_v49  ;;  %v4206_v49 = vld [vmem:[%s4775_s11 + $0xd0] ss:$8 sps:$4 sm:$0xff]  }
 0x100   :  { %728 = vmatprep.subr.bf16.mxu1 %v3457_v50  ;;  %4865 = vst [vmem:[#allocation24_spill] sm:$0xff] %v4206_v49  ;;  %v4214_v50 = vld [vmem:[%s4774_s10 + $0xe4] ss:$8 sps:$4 sm:$0xff]  }
 0x101   :  { %635 = vmatpush1.bf16.msra.mxu0 %v3455_v51 }
 0x102   :  { %636 = vmatprep.subr.bf16.mxu0 %v3460_v52 }
 0x103   :  { %729 = vmatpush1.bf16.msra.mxu1 %v3455_v51  ;;  %v4219_v51 = vld [vmem:[%s4774_s10 + $0xe0] ss:$8 sps:$4 sm:$0xff]  }
 0x104   :  { %730 = vmatprep.subr.bf16.mxu1 %v3460_v52  ;;  %v4224_v52 = vld [vmem:[%s4775_s11 + $0xe4] ss:$8 sps:$4 sm:$0xff]  }
 0x105   :  { %637 = vmatpush1.bf16.msra.mxu0 %v3458_v53  ;;  %4866 = vst [vmem:[#allocation25_spill] sm:$0xff] %v4224_v52 }
 0x106   :  { %638 = vmatprep.subr.bf16.mxu0 %v3463_v54 }
 0x107   :  { %731 = vmatpush1.bf16.msra.mxu1 %v3458_v53  ;;  %v4230_v53 = vld [vmem:[%s4775_s11 + $0xe0] ss:$8 sps:$4 sm:$0xff]  }
 0x108   :  { %732 = vmatprep.subr.bf16.mxu1 %v3463_v54  ;;  %4867 = vst [vmem:[#allocation26_spill] sm:$0xff] %v4230_v53  ;;  %v4238_v54 = vld [vmem:[%s4774_s10 + $0xf4] ss:$8 sps:$4 sm:$0xff]  }
 0x109   :  { %639 = vmatpush1.bf16.msra.mxu0 %v3461_v55 }
 0x10a   :  { %1061 = vmatprep.subr.bf16.mxu0 %v3874_v56 }
 0x10b   :  { %733 = vmatpush1.bf16.msra.mxu1 %v3461_v55  ;;  %v4243_v55 = vld [vmem:[%s4774_s10 + $0xf0] ss:$8 sps:$4 sm:$0xff]  }
 0x10c   :  { %657 = vmatmul.mubr.f32.vlgmr.msra.gmra.mrb[8].mxu0 %v380_v39  ;;  %1266 = vmatprep.subr.bf16.mxu1 %v3879_v57  ;;  %v4145_v39 = vld [vmem:[%s4775_s11 + $0xb4] ss:$8 sps:$4 sm:$0xff]  }
 0x10d   :  { %662 = vmatprep.mubr.f32.mxu0 %v4796_v4  ;;  %1062 = vmatpush1.bf16.msra.mxu0 %v3884_v58  ;;  %4860 = vst [vmem:[#allocation19_spill] sm:$0xff] %v4145_v39 }
 0x10e   :  { %751 = vmatmul.mubr.f32.vlgmr.msra.gmra.mrb[8].mxu1 %v3819_v33  ;;  %1063 = vmatprep.subr.bf16.mxu0 %v3890_v59  ;;  %v4110_v33 = vld [vmem:[%s4775_s11 + $0x90] ss:$8 sps:$4 sm:$0xff]  }
 0x10f   :  { %756 = vmatprep.mubr.f32.mxu1 %v4796_v4  ;;  %1267 = vmatpush1.bf16.msra.mxu1 %v3895_v60  ;;  %4857 = vst [vmem:[#allocation16_spill] sm:$0xff] %v4110_v33  ;;  %v4248_v4 = vld [vmem:[%s4775_s11 + $0xf4] ss:$8 sps:$4 sm:$0xff]  }
 0x110   :  { %663 = vmatmul.mubr.f32.gmra.mrb[10].mxu0 %v383_v43  ;;  %1268 = vmatprep.subr.bf16.mxu1 %v3901_v61  ;;  %v4169_v43 = vld [vmem:[%s4775_s11 + $0xc4] ss:$8 sps:$4 sm:$0xff]   ;;  %4868 = vst [vmem:[#allocation27_spill] sm:$0xff] %v4248_v4 }
 0x111   :  { %1064 = vmatpush1.bf16.msra.mxu0 %v3908_v62  ;;  %4862 = vst [vmem:[#allocation21_spill] sm:$0xff] %v4169_v43 }
 0x112   :  { %757 = vmatmul.mubr.f32.gmra.mrb[10].mxu1 %v3824_v37  ;;  %1065 = vmatprep.subr.bf16.mxu0 %v3915_v63  ;;  %v4134_v37 = vld [vmem:[%s4775_s11 + $0xa0] ss:$8 sps:$4 sm:$0xff]  }
 0x113   :  { %1269 = vmatpush1.bf16.msra.mxu1 %v3922_v1  ;;  %4859 = vst [vmem:[#allocation18_spill] sm:$0xff] %v4134_v37 }
 0x114   :  { %1270 = vmatprep.subr.bf16.mxu1 %v3928_v2 }
 0x115   :  { %1066 = vmatpush1.bf16.msra.mxu0 %v3934_v3 }
 0x116   :  { %1067 = vmatprep.subr.bf16.mxu0 %v3941_v5 }
 0x117   :  { %1271 = vmatpush1.bf16.msra.mxu1 %v3947_v6 }
 0x118   :  { %1272 = vmatprep.subr.bf16.mxu1 %v3953_v7 }
 0x119   :  { %1068 = vmatpush1.bf16.msra.mxu0 %v3959_v8 }
 0x11a   :  { %1069 = vmatprep.subr.bf16.mxu0 %v3965_v9 }
 0x11b   :  { %1273 = vmatpush1.bf16.msra.mxu1 %v3971_v10 }
 0x11c   :  { %1274 = vmatprep.subr.bf16.mxu1 %v3977_v11 }
 0x11d   :  { %1070 = vmatpush1.bf16.msra.mxu0 %v3983_v12 }
 0x11e   :  { %1071 = vmatprep.subr.bf16.mxu0 %v3989_v13 }
 0x11f   :  { %1275 = vmatpush1.bf16.msra.mxu1 %v3995_v14 }
 0x120   :  { %1276 = vmatprep.subr.bf16.mxu1 %v4001_v15 }
 0x121   :  { %1072 = vmatpush1.bf16.msra.mxu0 %v4007_v16 }
 0x122   :  { %1073 = vmatprep.subr.bf16.mxu0 %v4022_v18 }
 0x123   :  { %1277 = vmatpush1.bf16.msra.mxu1 %v4014_v17 }
 0x124   :  { %1278 = vmatprep.subr.bf16.mxu1 %v4032_v20 }
 0x125   :  { %1074 = vmatpush1.bf16.msra.mxu0 %v4027_v19 }
 0x126   :  { %1075 = vmatprep.subr.bf16.mxu0 %v4046_v22 }
 0x127   :  { %1279 = vmatpush1.bf16.msra.mxu1 %v4038_v21 }
 0x128   :  { %1280 = vmatprep.subr.bf16.mxu1 %v4056_v24 }
 0x129   :  { %1076 = vmatpush1.bf16.msra.mxu0 %v4051_v23 }
 0x12a   :  { %1077 = vmatprep.subr.bf16.mxu0 %v4067_v26 }
 0x12b   :  { %1281 = vmatpush1.bf16.msra.mxu1 %v4062_v25 }
 0x12c   :  { %1282 = vmatprep.subr.bf16.mxu1 %v4079_v28 }
 0x12d   :  { %1078 = vmatpush1.bf16.msra.mxu0 %v4074_v27 }
 0x12e   :  { %1079 = vmatprep.subr.bf16.mxu0 %v4091_v30 }
 0x12f   :  { %1283 = vmatpush1.bf16.msra.mxu1 %v4086_v29 }
 0x130   :  { %1284 = vmatprep.subr.bf16.mxu1 %v4097_v31 }
 0x131   :  { %1080 = vmatpush1.bf16.msra.mxu0 %v4103_v32 }
 0x132   :  { %1081 = vmatprep.subr.bf16.mxu0 %v4115_v34 }
 0x133   :  { %1285 = vmatpush1.bf16.msra.mxu1 %v4110_v33 }
 0x134   :  { %1286 = vmatprep.subr.bf16.mxu1 %v4121_v35 }
 0x135   :  { %1082 = vmatpush1.bf16.msra.mxu0 %v4127_v36 }
 0x136   :  { %1083 = vmatprep.subr.bf16.mxu0 %v4139_v38 }
 0x137   :  { %1287 = vmatpush1.bf16.msra.mxu1 %v4134_v37 }
 0x138   :  { %1288 = vmatprep.subr.bf16.mxu1 %v4145_v39  ;;  %v800_v39 = vld [vmem:[%s4777_s9] sm:$0x3] }
 0x139   :  { %1084 = vmatpush1.bf16.msra.mxu0 %v4151_v40 }
 0x13a   :  { %1085 = vmatprep.subr.bf16.mxu0 %v4163_v42 }
 0x13b   :  { %1289 = vmatpush1.bf16.msra.mxu1 %v4158_v41  ;;  %v763_v41 = vld [vmem:[%s4776_s8] sm:$0x3] }
 0x13c   :  { %1290 = vmatprep.subr.bf16.mxu1 %v4169_v43  ;;  %v764_v37 = vunpack.c.l.bf16 %v763_v41 }
 0x13d   :  { %1086 = vmatpush1.bf16.msra.mxu0 %v4175_v44 }
 0x13e   :  { %1087 = vmatprep.subr.bf16.mxu0 %v4187_v46 }
 0x13f   :  { %1291 = vmatpush1.bf16.msra.mxu1 %v4182_v45  ;;  %v766_v45 = vlaneseq }
 0x140   :  { %1292 = vmatprep.subr.bf16.mxu1 %v4193_v47 }
 0x141   :  { %1088 = vmatpush1.bf16.msra.mxu0 %v4199_v48  ;;  %v767_v43 = vshrl.u32 %v766_v45, 7 }
 0x142   :  { %1089 = vmatprep.subr.bf16.mxu0 %v4214_v50 }
 0x143   :  { %1293 = vmatpush1.bf16.msra.mxu1 %v4206_v49  ;;  %v4268_v35 = vsub.s32 2, %v767_v43 }
 0x144   :  { %1294 = vmatprep.subr.bf16.mxu1 %v4224_v52 }
 0x145   :  { %1090 = vmatpush1.bf16.msra.mxu0 %v4219_v51  ;;  %4871 = vst [vmem:[#allocation30_spill] sm:$0xff] %v4268_v35  ;;  %v773_v45 = vrot.slane %v764_v37, %v4268_v35 }
 0x146   :  { %1091 = vmatprep.subr.bf16.mxu0 %v4238_v54 }
 0x147   :  { %1295 = vmatpush1.bf16.msra.mxu1 %v4230_v53 }
 0x148   :  { %1296 = vmatprep.subr.bf16.mxu1 %v4248_v4  ;;  %v4266_v4 = vsub.s32 0, %v767_v43 }
 0x149   :  { %1092 = vmatpush1.bf16.msra.mxu0 %v4243_v55 }
 0x14a   :  { %1315 = vmatprep.subr.bf16.mxu0 %v3874_v56  ;;  %4870 = vst [vmem:[#allocation29_spill] sm:$0xff] %v4266_v4  ;;  %v769_v56 = vrot.slane %v764_v37, %v4266_v4  ;;  %v783_v41 = vrot.slane %v773_v45, %v4266_v4 }
 0x14b   :  { %1297 = vmatpush1.bf16.msra.mxu1 %v4254_v0  ;;  %v801_v0 = vunpack.c.l.bf16 %v800_v39 }
 0x14c   :  { %v779_v29 = vrot.slane %v769_v56, %v4266_v4 }
 0x14d   :  { %v806_v33 = vrot.slane %v801_v0, %v4266_v4  ;;  %v810_v31 = vrot.slane %v801_v0, %v4268_v35 }
 0x14f   :  { %v816_v28 = vrot.slane %v806_v33, %v4266_v4  ;;  %v820_v24 = vrot.slane %v810_v31, %v4266_v4 }
 0x1bf   :  { %v533_v53 = vpop.f32.mrb[4].mxu0 }
 0x1c0   :  { %v535_v52 = vpop.f32.mrb[5].mxu0 }
 0x1c3   :  { %v539_v49 = vpop.f32.mrb[6].mxu0 }
 0x1c4   :  { %v541_v47 = vpop.f32.mrb[7].mxu0 }
 0x1df   :  { %v658_v25 = vpop.f32.mrb[8].mxu0 }
 0x1e0   :  { %v669_v39 = vsub.f32 %v533_v53, %v658_v25  ;;  %v660_v43 = vpop.f32.mrb[9].mxu0 }
 0x1e1   :  { %v670_v21 = vsub.f32 %v535_v52, %v660_v43  ;;  %v752_v20 = vpop.f32.mrb[8].mxu1 }
 0x1e2   :  { %v784_v17 = vadd.f32 %v779_v29, %v669_v39  ;;  %v821_v15 = vadd.f32 %v816_v28, %v752_v20  ;;  %v754_v14 = vpop.f32.mrb[9].mxu1 }
 0x1e3   :  { %v785_v11 = vadd.f32 %v783_v41, %v670_v21  ;;  %v822_v37 = vadd.f32 %v820_v24, %v754_v14  ;;  %v664_v10 = vpop.f32.mrb[10].mxu0 }
 0x1e4   :  { %vm788_vm2 = vcmp.ge.f32.partialorder %v784_v17, 0.0  ;;  %v792_v0 = vmul.f32 0.1, %v784_v17  ;;  %vm825_vm3 = vcmp.ge.f32.partialorder %v821_v15, 0.0  ;;  %v829_v56 = vmul.f32 0.1, %v821_v15 }
 0x1e5   :  { %v830_v33 = vmul.f32 0.1, %v822_v37  ;;  %v671_v35 = vsub.f32 %v539_v49, %v664_v10  ;;  %v666_v7 = vpop.f32.mrb[11].mxu0  ;;  %v758_v45 = vpop.f32.mrb[10].mxu1  ;;  %vm789_vm4 = vcmp.ge.f32.partialorder %v785_v11, 0.0  ;;  %vm826_vm5 = vcmp.ge.f32.partialorder %v822_v37, 0.0 }
 0x1e6   :  { %v672_v25 = vsub.f32 %v541_v47, %v666_v7  ;;  %v823_v31 = vadd.f32 %v816_v28, %v758_v45  ;;  %v760_v52 = vpop.f32.mrb[11].mxu1  ;;  %v793_v53 = vmul.f32 0.1, %v785_v11  ;;  %v4278_v39 = vsel %vm825_vm3, %v821_v15, %v829_v56  ;;  %v4890_v47 = vld [vmem:[#allocation20_spill] sm:$0xff]  ;;  %v4469_v56 = vld [vmem:[%s4779_s15] sm:$0xff]   ;;  %v4482_v45 = vld [vmem:[%s4779_s15 + $0x8] sm:$0xff]  }
 0x1e7   :  { %v786_v20 = vadd.f32 %v779_v29, %v671_v35  ;;  %v824_v21 = vadd.f32 %v820_v24, %v760_v52  ;;  %v834_v14 = vsel %vm826_vm5, %v822_v37, %v830_v33  ;;  %v4283_v10 = vsel %vm788_vm2, %v784_v17, %v792_v0  ;;  %v4441_v29 = vld [vmem:[%s4778_s14 + $0x38] sm:$0xff]   ;;  %v4897_v37 = vld [vmem:[#allocation27_spill] sm:$0xff]  ;;  %v4898_v0 = vld [vmem:[#allocation28_spill] sm:$0xff] }
 0x1e8   :  { %v787_v43 = vadd.f32 %v783_v41, %v672_v25  ;;  %v831_v4 = vmul.f32 0.1, %v823_v31  ;;  %v4280_v6 = vsel %vm789_vm4, %v785_v11, %v793_v53  ;;  %1298 = vmatprep.mubr.f32.mxu1 %v834_v14  ;;  %vm827_vm7 = vcmp.ge.f32.partialorder %v823_v31, 0.0  ;;  %v4883_v35 = vld [vmem:[#allocation13_spill] sm:$0xff]  ;;  %v4896_v41 = vld [vmem:[#allocation26_spill] sm:$0xff]  ;;  %v4474_v33 = vld [vmem:[%s4779_s15 + $0x48] sm:$0xff]  }
 0x1e9   :  { %v832_v49 = vmul.f32 0.1, %v824_v21  ;;  %1093 = vmatprep.mubr.f32.mxu0 %v4280_v6  ;;  %1299 = vmatmul.mubr.f32.vlgmr.msra.gmra.mrb[12].mxu1 %v4278_v39  ;;  %vm828_vm6 = vcmp.ge.f32.partialorder %v824_v21, 0.0  ;;  %v794_v7 = vmul.f32 0.1, %v786_v20  ;;  %vm790_vm9 = vcmp.ge.f32.partialorder %v786_v20, 0.0 }
 0x1ea   :  { %1094 = vmatmul.mubr.f32.vlgmr.msra.gmra.mrb[12].mxu0 %v4283_v10  ;;  %vm791_vm8 = vcmp.ge.f32.partialorder %v787_v43, 0.0  ;;  %v795_v15 = vmul.f32 0.1, %v787_v43  ;;  %v4295_v17 = vsel %vm827_vm7, %v823_v31, %v831_v4  ;;  %v4313_v4 = vld [vmem:[%s4778_s14] sm:$0xff]   ;;  %v4488_v25 = vld [vmem:[%s4779_s15 + $0x50] sm:$0xff]   ;;  %v4501_v52 = vld [vmem:[%s4779_s15 + $0x58] sm:$0xff]  }
 0x1eb   :  { %1316 = vmatpush1.bf16.msra.mxu0 %v3884_v58  ;;  %v4289_v11 = vsel %vm828_vm6, %v824_v21, %v832_v49  ;;  %v4298_v28 = vsel %vm790_vm9, %v786_v20, %v794_v7  ;;  %v4306_v58 = vld [vmem:[%s4778_s14 + $0x40] sm:$0xff]   ;;  %v4495_v31 = vld [vmem:[%s4779_s15 + $0x10] sm:$0xff]   ;;  %v4507_v53 = vld [vmem:[%s4779_s15 + $0x18] sm:$0xff]  }
 0x1ec   :  { %v4291_v24 = vsel %vm791_vm8, %v787_v43, %v795_v15  ;;  %1304 = vmatprep.mubr.f32.mxu1 %v4289_v11  ;;  %1317 = vmatprep.subr.bf16.mxu0 %v3890_v59  ;;  %v4320_v59 = vld [vmem:[%s4778_s14 + $0x48] sm:$0xff]   ;;  %v4519_v20 = vld [vmem:[%s4779_s15 + $0x20] sm:$0xff]   ;;  %v4537_v43 = vld [vmem:[%s4779_s15 + $0x70] sm:$0xff]   ;;  %v4899_v15 = vmov 0.0|0.0  }
 0x1ed   :  { %1099 = vmatprep.mubr.f32.mxu0 %v4291_v24  ;;  %1305 = vmatmul.mubr.f32.gmra.mrb[14].mxu1 %v4295_v17  ;;  %v4525_v21 = vld [vmem:[%s4779_s15 + $0x68] sm:$0xff]   ;;  %v3589_v49 = vld [vmem:[%s4779_s15 + $0x78] sm:$0xff]  }
 0x1ee   :  { %1100 = vmatmul.mubr.f32.gmra.mrb[14].mxu0 %v4298_v28  ;;  %3029 = vmatprep.subr.bf16.mxu1 %v4306_v58  ;;  %v3591_v7 = vld [vmem:[%s4779_s15 + $0x38] sm:$0xff]  }
 0x1ef   :  { %1318 = vmatpush1.bf16.msra.mxu0 %v3908_v62  ;;  %1347 = vmatprep.mubr.f32.mxu0 %v834_v14  ;;  %v4327_v62 = vld [vmem:[%s4778_s14 + $0x8] sm:$0xff]  }
 0x1f0   :  { %1319 = vmatprep.subr.bf16.mxu0 %v3915_v63  ;;  %3030 = vmatpush3.bf16.msra.mxu1 %v4313_v4  ;;  %v4334_v63 = vld [vmem:[%s4778_s14 + $0x50] sm:$0xff]   ;;  %v4531_v14 = vld [vmem:[%s4779_s15 + $0x28] sm:$0xff]  }
 0x1f1   :  { %3031 = vmatprep.subr.bf16.mxu1 %v4320_v59 }
 0x1f3   :  { %1320 = vmatpush1.bf16.msra.mxu0 %v3934_v3  ;;  %v4341_v3 = vld [vmem:[%s4778_s14 + $0x10] sm:$0xff]  }
 0x1f4   :  { %1321 = vmatprep.subr.bf16.mxu0 %v3941_v5  ;;  %3032 = vmatpush3.bf16.msra.mxu1 %v4327_v62  ;;  %v4348_v5 = vld [vmem:[%s4778_s14 + $0x58] sm:$0xff]  }
 0x1f5   :  { %3033 = vmatprep.subr.bf16.mxu1 %v4334_v63 }
 0x1f7   :  { %1322 = vmatpush1.bf16.msra.mxu0 %v3959_v8  ;;  %v4355_v8 = vld [vmem:[%s4778_s14 + $0x18] sm:$0xff]  }
 0x1f8   :  { %1323 = vmatprep.subr.bf16.mxu0 %v3965_v9  ;;  %3034 = vmatpush3.bf16.msra.mxu1 %v4341_v3  ;;  %v4362_v9 = vld [vmem:[%s4778_s14 + $0x60] sm:$0xff]  }
 0x1f9   :  { %3035 = vmatprep.subr.bf16.mxu1 %v4348_v5 }
 0x1fb   :  { %1324 = vmatpush1.bf16.msra.mxu0 %v3983_v12  ;;  %v4369_v12 = vld [vmem:[%s4778_s14 + $0x20] sm:$0xff]  }
 0x1fc   :  { %1325 = vmatprep.subr.bf16.mxu0 %v3989_v13  ;;  %3036 = vmatpush3.bf16.msra.mxu1 %v4355_v8  ;;  %v4376_v13 = vld [vmem:[%s4778_s14 + $0x68] sm:$0xff]  }
 0x1fd   :  { %3037 = vmatprep.subr.bf16.mxu1 %v4362_v9 }
 0x1ff   :  { %1326 = vmatpush1.bf16.msra.mxu0 %v4007_v16  ;;  %v4383_v16 = vld [vmem:[%s4778_s14 + $0x28] sm:$0xff]  }
 0x200   :  { %1327 = vmatprep.subr.bf16.mxu0 %v4022_v18  ;;  %3038 = vmatpush3.bf16.msra.mxu1 %v4369_v12  ;;  %v4872_v18 = vld [vmem:[#allocation2_spill] sm:$0xff] }
 0x201   :  { %3039 = vmatprep.subr.bf16.mxu1 %v4376_v13 }
 0x203   :  { %1328 = vmatpush1.bf16.msra.mxu0 %v4027_v19  ;;  %v4873_v19 = vld [vmem:[#allocation3_spill] sm:$0xff] }
 0x204   :  { %1329 = vmatprep.subr.bf16.mxu0 %v4046_v22  ;;  %3040 = vmatpush3.bf16.msra.mxu1 %v4383_v16  ;;  %v4875_v22 = vld [vmem:[#allocation5_spill] sm:$0xff] }
 0x207   :  { %1330 = vmatpush1.bf16.msra.mxu0 %v4051_v23  ;;  %v4876_v23 = vld [vmem:[#allocation6_spill] sm:$0xff] }
 0x208   :  { %1331 = vmatprep.subr.bf16.mxu0 %v4067_v26  ;;  %v4435_v26 = vld [vmem:[%s4778_s14 + $0x78] sm:$0xff]  }
 0x20b   :  { %1332 = vmatpush1.bf16.msra.mxu0 %v4074_v27  ;;  %v4880_v27 = vld [vmem:[#allocation10_spill] sm:$0xff] }
 0x20c   :  { %1333 = vmatprep.subr.bf16.mxu0 %v4091_v30  ;;  %v4881_v30 = vld [vmem:[#allocation11_spill] sm:$0xff] }
 0x20f   :  { %1334 = vmatpush1.bf16.msra.mxu0 %v4103_v32  ;;  %v3561_v32 = vld [vmem:[%s4779_s15 + $0x40] sm:$0xff]  }
 0x210   :  { %1335 = vmatprep.subr.bf16.mxu0 %v4115_v34  ;;  %v4882_v34 = vld [vmem:[#allocation12_spill] sm:$0xff] }
 0x213   :  { %1336 = vmatpush1.bf16.msra.mxu0 %v4127_v36  ;;  %v4884_v36 = vld [vmem:[#allocation14_spill] sm:$0xff] }
 0x214   :  { %1337 = vmatprep.subr.bf16.mxu0 %v4139_v38  ;;  %v4885_v38 = vld [vmem:[#allocation15_spill] sm:$0xff] }
 0x217   :  { %1338 = vmatpush1.bf16.msra.mxu0 %v4151_v40  ;;  %v4886_v40 = vld [vmem:[#allocation16_spill] sm:$0xff] }
 0x218   :  { %1339 = vmatprep.subr.bf16.mxu0 %v4163_v42  ;;  %v4887_v42 = vld [vmem:[#allocation17_spill] sm:$0xff] }
 0x21b   :  { %1340 = vmatpush1.bf16.msra.mxu0 %v4175_v44  ;;  %v4888_v44 = vld [vmem:[#allocation18_spill] sm:$0xff] }
 0x21c   :  { %1341 = vmatprep.subr.bf16.mxu0 %v4187_v46  ;;  %v4889_v46 = vld [vmem:[#allocation19_spill] sm:$0xff] }
 0x21f   :  { %1342 = vmatpush1.bf16.msra.mxu0 %v4199_v48  ;;  %v4891_v48 = vld [vmem:[#allocation21_spill] sm:$0xff] }
 0x220   :  { %1343 = vmatprep.subr.bf16.mxu0 %v4214_v50  ;;  %v4892_v50 = vld [vmem:[#allocation22_spill] sm:$0xff] }
 0x223   :  { %1344 = vmatpush1.bf16.msra.mxu0 %v4219_v51  ;;  %v4893_v51 = vld [vmem:[#allocation23_spill] sm:$0xff] }
 0x224   :  { %1345 = vmatprep.subr.bf16.mxu0 %v4238_v54  ;;  %v4894_v54 = vld [vmem:[#allocation24_spill] sm:$0xff] }
 0x227   :  { %1346 = vmatpush1.bf16.msra.mxu0 %v4243_v55  ;;  %v4895_v55 = vld [vmem:[#allocation25_spill] sm:$0xff] }
 0x228   :  { %1360 = vmatprep.subr.bf16.mxu0 %v3879_v57  ;;  %v4874_v57 = vld [vmem:[#allocation4_spill] sm:$0xff] }
 0x22a   :  { %1348 = vmatmul.mubr.f32.vlgmr.msra.gmra.mrb[16].mxu0 %v4278_v39  ;;  %v4513_v39 = vld [vmem:[%s4779_s15 + $0x60] sm:$0xff]  }
 0x22b   :  { %1353 = vmatprep.mubr.f32.mxu0 %v4289_v11  ;;  %1361 = vmatpush1.bf16.msra.mxu0 %v3895_v60  ;;  %v4877_v60 = vld [vmem:[#allocation7_spill] sm:$0xff]  ;;  %v1405_v11 = vld [vmem:[%s4780_s12] sm:$0x3] }
 0x22c   :  { %1362 = vmatprep.subr.bf16.mxu0 %v3901_v61  ;;  %v4421_v61 = vld [vmem:[%s4778_s14 + $0x70] sm:$0xff]  }
 0x22d   :  { %3041 = vmatprep.subr.bf16.mxu1 %v4421_v61 }
 0x22e   :  { %1354 = vmatmul.mubr.f32.gmra.mrb[18].mxu0 %v4295_v17  ;;  %v4900_v17 = vld [vmem:[#allocation29_spill] sm:$0xff] }
 0x22f   :  { %1363 = vmatpush1.bf16.msra.mxu0 %v3922_v1  ;;  %1392 = vmatprep.mubr.f32.mxu0 %v4280_v6  ;;  %v4878_v1 = vld [vmem:[#allocation8_spill] sm:$0xff]  ;;  %v4879_v6 = vld [vmem:[#allocation9_spill] sm:$0xff] }
 0x230   :  { %1364 = vmatprep.subr.bf16.mxu0 %v3928_v2  ;;  %v4427_v2 = vld [vmem:[%s4778_s14 + $0x30] sm:$0xff]  }
 0x231   :  { %3042 = vmatpush3.bf16.msra.mxu1 %v4427_v2 }
 0x232   :  { %3043 = vmatprep.subr.bf16.mxu1 %v4435_v26 }
 0x233   :  { %1365 = vmatpush1.bf16.msra.mxu0 %v4872_v18  ;;  %v4901_v18 = vld [vmem:[#allocation30_spill] sm:$0xff] }
 0x234   :  { %1366 = vmatprep.subr.bf16.mxu0 %v4873_v19 }
 0x235   :  { %3044 = vmatpush3.bf16.msra.mxu1 %v4441_v29 }
 0x236   :  { %3051 = vmatprep.subr.bf16.mxu1 %v3561_v32 }
 0x237   :  { %1367 = vmatpush1.bf16.msra.mxu0 %v4874_v57 }
 0x238   :  { %1368 = vmatprep.subr.bf16.mxu0 %v4875_v22 }
 0x23b   :  { %1369 = vmatpush1.bf16.msra.mxu0 %v4876_v23 }
 0x23c   :  { %1370 = vmatprep.subr.bf16.mxu0 %v4877_v60 }
 0x23f   :  { %1371 = vmatpush1.bf16.msra.mxu0 %v4878_v1 }
 0x240   :  { %1372 = vmatprep.subr.bf16.mxu0 %v4879_v6 }
 0x243   :  { %1373 = vmatpush1.bf16.msra.mxu0 %v4880_v27 }
 0x244   :  { %1374 = vmatprep.subr.bf16.mxu0 %v4881_v30 }
 0x247   :  { %1375 = vmatpush1.bf16.msra.mxu0 %v4882_v34 }
 0x248   :  { %1376 = vmatprep.subr.bf16.mxu0 %v4883_v35 }
 0x24b   :  { %1377 = vmatpush1.bf16.msra.mxu0 %v4884_v36 }
 0x24c   :  { %1378 = vmatprep.subr.bf16.mxu0 %v4885_v38 }
 0x24f   :  { %1379 = vmatpush1.bf16.msra.mxu0 %v4886_v40 }
 0x250   :  { %1380 = vmatprep.subr.bf16.mxu0 %v4887_v42 }
 0x253   :  { %1381 = vmatpush1.bf16.msra.mxu0 %v4888_v44 }
 0x254   :  { %1382 = vmatprep.subr.bf16.mxu0 %v4889_v46 }
 0x257   :  { %1383 = vmatpush1.bf16.msra.mxu0 %v4890_v47 }
 0x258   :  { %1384 = vmatprep.subr.bf16.mxu0 %v4891_v48 }
 0x25b   :  { %1385 = vmatpush1.bf16.msra.mxu0 %v4892_v50 }
 0x25c   :  { %1386 = vmatprep.subr.bf16.mxu0 %v4893_v51 }
 0x25f   :  { %1387 = vmatpush1.bf16.msra.mxu0 %v4894_v54 }
 0x260   :  { %1388 = vmatprep.subr.bf16.mxu0 %v4895_v55 }
 0x263   :  { %1389 = vmatpush1.bf16.msra.mxu0 %v4896_v41 }
 0x264   :  { %1390 = vmatprep.subr.bf16.mxu0 %v4897_v37 }
 0x267   :  { %1391 = vmatpush1.bf16.msra.mxu0 %v4898_v0 }
 0x268   :  { %3095 = vmatprep.subr.bf16.mxu0 %v3561_v32 }
 0x26a   :  { %1393 = vmatmul.mubr.f32.vlgmr.msra.gmra.mrb[16].mxu0 %v4283_v10  ;;  %v4543_v10 = vld [vmem:[%s4779_s15 + $0x30] sm:$0xff]  }
 0x26b   :  { %1398 = vmatprep.mubr.f32.mxu0 %v4291_v24  ;;  %3096 = vmatpush3.bf16.msra.mxu0 %v4469_v56  ;;  %v1406_v24 = vunpack.c.l.bf16 %v1405_v11  ;;  %v4902_v11 = vmov 0.0  }
 0x26c   :  { %3097 = vmatprep.subr.bf16.mxu0 %v4474_v33 }
 0x26d   :  { %v1415_v19 = vrot.slane %v1406_v24, %v4901_v18 }
 0x26e   :  { %1399 = vmatmul.mubr.f32.gmra.mrb[18].mxu0 %v4298_v28  ;;  %v1411_v28 = vrot.slane %v1406_v24, %v4900_v17 }
 0x26f   :  { %3098 = vmatpush3.bf16.msra.mxu0 %v4482_v45  ;;  %v1425_v1 = vrot.slane %v1415_v19, %v4900_v17 }
 0x270   :  { %3099 = vmatprep.subr.bf16.mxu0 %v4488_v25  ;;  %v1421_v22 = vrot.slane %v1411_v28, %v4900_v17 }
 0x273   :  { %3100 = vmatpush3.bf16.msra.mxu0 %v4495_v31 }
 0x274   :  { %3101 = vmatprep.subr.bf16.mxu0 %v4501_v52 }
 0x277   :  { %3102 = vmatpush3.bf16.msra.mxu0 %v4507_v53 }
 0x278   :  { %3103 = vmatprep.subr.bf16.mxu0 %v4513_v39 }
 0x27b   :  { %3104 = vmatpush3.bf16.msra.mxu0 %v4519_v20 }
 0x27c   :  { %3105 = vmatprep.subr.bf16.mxu0 %v4525_v21 }
 0x27f   :  { %3106 = vmatpush3.bf16.msra.mxu0 %v4531_v14 }
 0x280   :  { %3107 = vmatprep.subr.bf16.mxu0 %v4537_v43 }
 0x283   :  { %3108 = vmatpush3.bf16.msra.mxu0 %v4543_v10 }
 0x284   :  { %3109 = vmatprep.subr.bf16.mxu0 %v3589_v49 }
 0x287   :  { %3110 = vmatpush3.bf16.msra.mxu0 %v3591_v7 }
 0x288   :  { %3371 = vmatprep.subr.bf16.mxu0 %v4899_v15 }
 0x2bc   :  { %v1300_v57 = vpop.f32.mrb[12].mxu1 }
 0x2bd   :  { %v1095_v23 = vpop.f32.mrb[12].mxu0  ;;  %v1302_v60 = vpop.f32.mrb[13].mxu1 }
 0x2be   :  { %v1311_v6 = vsub.f32 %v1095_v23, %v1300_v57  ;;  %v1097_v27 = vpop.f32.mrb[13].mxu0 }
 0x2bf   :  { %v1312_v30 = vsub.f32 %v1097_v27, %v1302_v60 }
 0x2c0   :  { %v1426_v32 = vadd.f32 %v1421_v22, %v1311_v6  ;;  %v1306_v34 = vpop.f32.mrb[14].mxu1 }
 0x2c1   :  { %v1427_v35 = vadd.f32 %v1425_v1, %v1312_v30  ;;  %v1101_v36 = vpop.f32.mrb[14].mxu0  ;;  %v1308_v38 = vpop.f32.mrb[15].mxu1 }
 0x2c2   :  { %v1434_v40 = vmul.f32 0.1, %v1426_v32  ;;  %v1313_v42 = vsub.f32 %v1101_v36, %v1306_v34  ;;  %v1103_v44 = vpop.f32.mrb[15].mxu0  ;;  %vm1430_vm10 = vcmp.ge.f32.partialorder %v1426_v32, 0.0 }
 0x2c3   :  { %v1314_v46 = vsub.f32 %v1103_v44, %v1308_v38  ;;  %vm1431_vm11 = vcmp.ge.f32.partialorder %v1427_v35, 0.0  ;;  %v1435_v47 = vmul.f32 0.1, %v1427_v35  ;;  %v1917_v44 = vld [vmem:[%s4785_s17] sm:$0x1] }
 0x2c4   :  { %v1428_v48 = vadd.f32 %v1421_v22, %v1313_v42  ;;  %v1438_v54 = vsel %vm1430_vm10, %v1426_v32, %v1434_v40  ;;  %v3592_v40 = vld [vmem:[%s4782_s5] sm:$0xff]  }
 0x2c5   :  { %v1429_v50 = vadd.f32 %v1425_v1, %v1314_v46  ;;  %v1439_v51 = vsel %vm1431_vm11, %v1427_v35, %v1435_v47  ;;  %v3593_v42 = vld [vmem:[%s4783_s4] sm:$0xff]  }
 0x2c6   :  { %1671 = vmatprep.mubr.f32.mxu1 %v1439_v51  ;;  %1898 = vmatprep.mubr.f32.mxu0 %v1439_v51  ;;  %v1436_v55 = vmul.f32 0.1, %v1428_v48  ;;  %vm1432_vm13 = vcmp.ge.f32.partialorder %v1428_v48, 0.0 }
 0x2c7   :  { %1672 = vmatmul.mubr.f32.vlgmr.msra.gmra.mrb[16].mxu1 %v1438_v54  ;;  %1899 = vmatmul.mubr.f32.vlgmr.msra.gmra.mrb[20].mxu0 %v1438_v54  ;;  %vm1433_vm12 = vcmp.ge.f32.partialorder %v1429_v50, 0.0  ;;  %v1437_v41 = vmul.f32 0.1, %v1429_v50 }
 0x2c8   :  { %3052 = vmatpush3.bf16.msra.mxu1 %v4469_v56  ;;  %v1440_v0 = vsel %vm1432_vm13, %v1428_v48, %v1436_v55  ;;  %v1442_v56 = vld [vmem:[%s4781_s13] sm:$0x3] }
 0x2c9   :  { %v1441_v37 = vsel %vm1433_vm12, %v1429_v50, %v1437_v41  ;;  %3053 = vmatprep.subr.bf16.mxu1 %v4474_v33  ;;  %v1443_v33 = vunpack.c.l.bf16 %v1442_v56  ;;  %v1918_v50 = vunpack.c.l.bf16 %v1917_v44 }
 0x2ca   :  { %1676 = vmatprep.mubr.f32.mxu1 %v1441_v37  ;;  %1903 = vmatprep.mubr.f32.mxu0 %v1441_v37 }
 0x2cb   :  { %1677 = vmatmul.mubr.f32.gmra.mrb[18].mxu1 %v1440_v0  ;;  %1904 = vmatmul.mubr.f32.gmra.mrb[22].mxu0 %v1440_v0  ;;  %v1922_v41 = vrot.slane %v1918_v50, %v4900_v17 }
 0x2cc   :  { %3054 = vmatpush3.bf16.msra.mxu1 %v4482_v45  ;;  %3233 = vmatprep.mubr.msk.bf16.mxu0 %vm3617_vm0, %v4902_v11  ;;  %v1448_v45 = vrot.slane %v1443_v33, %v4900_v17 }
 0x2cd   :  { %3055 = vmatprep.subr.bf16.mxu1 %v4488_v25  ;;  %v1452_v25 = vrot.slane %v1443_v33, %v4901_v18 }
 0x2d0   :  { %3056 = vmatpush3.bf16.msra.mxu1 %v4495_v31  ;;  %v1458_v31 = vrot.slane %v1448_v45, %v4900_v17 }
 0x2d1   :  { %3057 = vmatprep.subr.bf16.mxu1 %v4501_v52  ;;  %v1462_v52 = vrot.slane %v1452_v25, %v4900_v17 }
 0x2d4   :  { %3058 = vmatpush3.bf16.msra.mxu1 %v4507_v53 }
 0x2d5   :  { %3059 = vmatprep.subr.bf16.mxu1 %v4513_v39 }
 0x2d8   :  { %3060 = vmatpush3.bf16.msra.mxu1 %v4519_v20 }
 0x2d9   :  { %3061 = vmatprep.subr.bf16.mxu1 %v4525_v21 }
 0x2dc   :  { %3062 = vmatpush3.bf16.msra.mxu1 %v4531_v14 }
 0x2dd   :  { %3063 = vmatprep.subr.bf16.mxu1 %v4537_v43 }
 0x2e0   :  { %3064 = vmatpush3.bf16.msra.mxu1 %v4543_v10 }
 0x2e1   :  { %3065 = vmatprep.subr.bf16.mxu1 %v3589_v49 }
 0x2e4   :  { %3066 = vmatpush3.bf16.msra.mxu1 %v3591_v7 }
 0x2e5   :  { %3073 = vmatprep.subr.bf16.mxu1 %v4306_v58 }
 0x33d   :  { %v1394_v53 = vpop.f32.mrb[16].mxu0 }
 0x33e   :  { %v1463_v39 = vadd.f32 %v1458_v31, %v1394_v53  ;;  %v1396_v20 = vpop.f32.mrb[17].mxu0  ;;  %v3610_v53 = vld [vmem:[%s4837_s26] sm:$0xff] }
 0x33f   :  { %v1464_v21 = vadd.f32 %v1462_v52, %v1396_v20  ;;  %vm2239_vm4 = vcmp.ne.f32.partialorder %v3610_v53, 0.0  ;;  %v3612_v20 = vld [vmem:[%s4837_s26 + $0x8] sm:$0xff] }
 0x340   :  { %v1471_v14 = vmul.f32 0.1, %v1463_v39  ;;  %vm1467_vm14 = vcmp.ge.f32.partialorder %v1463_v39, 0.0  ;;  %vm2240_vm6 = vcmp.ne.f32.partialorder %v3612_v20, 0.0 }
 0x341   :  { %v1472_v58 = vmul.f32 0.1, %v1464_v21  ;;  %v1400_v43 = vpop.f32.mrb[18].mxu0  ;;  %vm1468_vm15 = vcmp.ge.f32.partialorder %v1464_v21, 0.0 }
 0x342   :  { %v1465_v10 = vadd.f32 %v1458_v31, %v1400_v43  ;;  %v1402_v49 = vpop.f32.mrb[19].mxu0  ;;  %v1475_v28 = vsel %vm1467_vm14, %v1463_v39, %v1471_v14  ;;  %v3611_v39 = vld [vmem:[%s4840_s2] sm:$0xff] }
 0x343   :  { %v1466_v7 = vadd.f32 %v1462_v52, %v1402_v49  ;;  %v1476_v24 = vsel %vm1468_vm15, %v1464_v21, %v1472_v58  ;;  %vm2241_vm5 = vcmp.ne.f32.partialorder %v3611_v39, 0.0  ;;  %v3613_v21 = vld [vmem:[%s4840_s2 + $0x8] sm:$0xff] }
 0x344   :  { %v1473_v19 = vmul.f32 0.1, %v1465_v10  ;;  %1810 = vmatprep.mubr.f32.mxu1 %v1476_v24  ;;  %vm1469_vm3 = vcmp.ge.f32.partialorder %v1465_v10, 0.0  ;;  %vm2242_vm7 = vcmp.ne.f32.partialorder %v3613_v21, 0.0  ;;  %vm2243_vm8 = vmor %vm2239_vm4, %vm2241_vm5 }
 0x345   :  { %v1474_v18 = vmul.f32 0.1, %v1466_v7  ;;  %1811 = vmatmul.mubr.f32.vlgmr.msra.gmra.mrb[20].mxu1 %v1475_v28  ;;  %vm1470_vm2 = vcmp.ge.f32.partialorder %v1466_v7, 0.0  ;;  %vm2244_vm9 = vmor %vm2240_vm6, %vm2242_vm7 }
 0x346   :  { %3074 = vmatpush3.bf16.msra.mxu1 %v4313_v4  ;;  %v1477_v22 = vsel %vm1469_vm3, %v1465_v10, %v1473_v19 }
 0x347   :  { %v1478_v57 = vsel %vm1470_vm2, %v1466_v7, %v1474_v18  ;;  %3075 = vmatprep.subr.bf16.mxu1 %v4320_v59 }
 0x348   :  { %1815 = vmatprep.mubr.f32.mxu1 %v1478_v57 }
 0x349   :  { %1816 = vmatmul.mubr.f32.gmra.mrb[22].mxu1 %v1477_v22 }
 0x34a   :  { %3076 = vmatpush3.bf16.msra.mxu1 %v4327_v62  ;;  %1855 = vmatprep.mubr.f32.mxu1 %v1476_v24 }
 0x34b   :  { %3077 = vmatprep.subr.bf16.mxu1 %v4334_v63 }
 0x34e   :  { %3078 = vmatpush3.bf16.msra.mxu1 %v4341_v3 }
 0x34f   :  { %3079 = vmatprep.subr.bf16.mxu1 %v4348_v5 }
 0x352   :  { %3080 = vmatpush3.bf16.msra.mxu1 %v4355_v8 }
 0x353   :  { %3081 = vmatprep.subr.bf16.mxu1 %v4362_v9 }
 0x356   :  { %3082 = vmatpush3.bf16.msra.mxu1 %v4369_v12 }
 0x357   :  { %3083 = vmatprep.subr.bf16.mxu1 %v4376_v13 }
 0x35a   :  { %3084 = vmatpush3.bf16.msra.mxu1 %v4383_v16 }
 0x35b   :  { %3085 = vmatprep.subr.bf16.mxu1 %v4421_v61 }
 0x35e   :  { %3086 = vmatpush3.bf16.msra.mxu1 %v4427_v2  ;;  %v1909_v2 = vld [vmem:[%s4784_s16] sm:$0x1] }
 0x35f   :  { %3087 = vmatprep.subr.bf16.mxu1 %v4435_v26  ;;  %v1910_v60 = vunpack.c.l.bf16 %v1909_v2  ;;  %v3602_v2 = vld [vmem:[%s4786_s18 + $0x20] sm:$0xff]  }
 0x361   :  { %v1914_v30 = vrot.slane %v1910_v60, %v4900_v17  ;;  %v3606_v60 = vld [vmem:[%s4786_s18 + $0x30] sm:$0xff]  }
 0x362   :  { %3088 = vmatpush3.bf16.msra.mxu1 %v4441_v29 }
 0x363   :  { %3365 = vmatprep.subr.bf16.mxu1 %v4899_v15 }
 0x365   :  { %1856 = vmatmul.mubr.f32.vlgmr.msra.gmra.mrb[24].mxu1 %v1475_v28 }
 0x366   :  { %1860 = vmatprep.mubr.f32.mxu1 %v1478_v57 }
 0x369   :  { %1861 = vmatmul.mubr.f32.gmra.mrb[26].mxu1 %v1477_v22 }
 0x36a   :  { %3217 = vmatprep.mubr.msk.bf16.mxu1 %vm3617_vm0, %v4902_v11 }
 0x39a   :  { %v3045_v4 = vpop.f32.mrb[16].mxu1  ;;  %v3111_v59 = vpop.f32.mrb[20].mxu0 }
 0x39b   :  { %v3046_v62 = vpop.f32.mrb[17].mxu1  ;;  %v3112_v63 = vpop.f32.mrb[21].mxu0 }
 0x39c   :  { %v3047_v3 = vadd.f32 %v3046_v62, %v3045_v4  ;;  %v3113_v5 = vadd.f32 %v3112_v63, %v3111_v59 }
 0x39e   :  { %v3048_v8 = vpop.f32.mrb[18].mxu1  ;;  %v3114_v9 = vpop.f32.mrb[22].mxu0 }
 0x39f   :  { %v3049_v12 = vpop.f32.mrb[19].mxu1  ;;  %v3115_v13 = vpop.f32.mrb[23].mxu0 }
 0x3a0   :  { %v3050_v16 = vadd.f32 %v3049_v12, %v3048_v8  ;;  %v3116_v61 = vadd.f32 %v3115_v13, %v3114_v9  ;;  %v3614_v8 = vld [vmem:[%s4838_s0] sm:$0xff]   ;;  %v4673_v9 = vld [vmem:[%s4786_s18 + $0x8] sm:$0xff]   ;;  %v4696_v13 = vld [vmem:[%s4787_s19 + $0x10] sm:$0xff]  }
 0x3a1   :  { %v4681_v12 = vld [vmem:[%s4787_s19 + $0x8] sm:$0xff]  }
 0x418   :  { %v3067_v26 = vpop.f32.mrb[20].mxu1 }
 0x419   :  { %v3068_v29 = vpop.f32.mrb[21].mxu1 }
 0x41a   :  { %v3069_v23 = vadd.f32 %v3068_v29, %v3067_v26  ;;  %v4717_v26 = vld [vmem:[%s4787_s19 + $0x20] sm:$0xff]   ;;  %v3604_v29 = vld [vmem:[%s4786_s18 + $0x28] sm:$0xff]  }
 0x41c   :  { %v1821_v1 = vsub.f32 %v3047_v3, %v3069_v23  ;;  %v3070_v6 = vpop.f32.mrb[22].mxu1  ;;  %v4649_v3 = vld [vmem:[%s4786_s18] sm:$0xff]   ;;  %v3605_v23 = vld [vmem:[%s4787_s19 + $0x28] sm:$0xff]  }
 0x41d   :  { %v3071_v27 = vpop.f32.mrb[23].mxu1 }
 0x41e   :  { %v3072_v32 = vadd.f32 %v3071_v27, %v3070_v6  ;;  %v1915_v35 = vadd.f32 %v1914_v30, %v1821_v1  ;;  %v3607_v1 = vld [vmem:[%s4787_s19 + $0x30] sm:$0xff]   ;;  %v3608_v6 = vld [vmem:[%s4786_s18 + $0x38] sm:$0xff]  }
 0x41f   :  { %v3609_v27 = vld [vmem:[%s4787_s19 + $0x38] sm:$0xff]  }
 0x420   :  { %v1822_v34 = vsub.f32 %v3050_v16, %v3072_v32  ;;  %v3600_v16 = vld [vmem:[%s4786_s18 + $0x18] sm:$0xff]  }
 0x422   :  { %v1916_v36 = vadd.f32 %v1914_v30, %v1822_v34 }
 0x424   :  { %v3366_v38 = vpack.c.bf16 %v1916_v36, %v1915_v35 }
 0x426   :  { %3367 = vmatpush3.bf16.msra.mxu1 %v3366_v38  ;;  %3373 = vmatpush3.bf16.msra.mxu0 %v3366_v38 }
 0x427   :  { %3368 = vmatprep.subr.bf16.mxu1 %v4899_v15  ;;  %3374 = vmatprep.subr.bf16.mxu0 %v4899_v15 }
 0x429   :  { %3234 = vmatmul.mubr.msk.bf16.vlgmr.msra.gmra.mrb[24].mxu0 %vm81_vm1, %v3592_v40  ;;  %3218 = vmatmul.mubr.msk.bf16.vlgmr.msra.gmra.mrb[28].mxu1 %vm81_vm1, %v3593_v42 }
 0x42a   :  { %3225 = vmatprep.mubr.msk.bf16.mxu1 %vm3617_vm0, %v4902_v11  ;;  %3241 = vmatprep.mubr.msk.bf16.mxu0 %vm3617_vm0, %v4902_v11 }
 0x438   :  { %v3089_v46 = vpop.f32.mrb[24].mxu1 }
 0x439   :  { %v3090_v47 = vpop.f32.mrb[25].mxu1 }
 0x43a   :  { %v3091_v48 = vadd.f32 %v3090_v47, %v3089_v46 }
 0x43c   :  { %v1901_v51 = vadd.f32 %v3113_v5, %v3091_v48  ;;  %v3092_v54 = vpop.f32.mrb[26].mxu1  ;;  %v4654_v5 = vld [vmem:[%s4787_s19] sm:$0xff]  }
 0x43d   :  { %v3093_v55 = vpop.f32.mrb[27].mxu1 }
 0x43e   :  { %v3094_v37 = vadd.f32 %v3093_v55, %v3092_v54  ;;  %v1923_v56 = vadd.f32 %v1922_v41, %v1901_v51 }
 0x440   :  { %v1906_v0 = vadd.f32 %v3116_v61, %v3094_v37  ;;  %v4707_v61 = vld [vmem:[%s4787_s19 + $0x18] sm:$0xff]  }
 0x442   :  { %v1924_v33 = vadd.f32 %v1922_v41, %v1906_v0 }
 0x444   :  { %v3369_v45 = vpack.c.bf16 %v1924_v33, %v1923_v56 }
 0x446   :  { %3370 = vmatpush3.bf16.msra.mxu1 %v3369_v45  ;;  %3376 = vmatpush3.bf16.msra.mxu0 %v3369_v45 }
 0x447   :  { %3377 = vmatprep.subr.bf16.mxu1 %v4899_v15  ;;  %3383 = vmatprep.subr.bf16.mxu0 %v4899_v15 }
 0x449   :  { %3226 = vmatmul.mubr.msk.bf16.vlgmr.msra.gmra.mrb[32].mxu1 %vm81_vm1, %v3592_v40  ;;  %3242 = vmatmul.mubr.msk.bf16.vlgmr.msra.gmra.mrb[24].mxu0 %vm81_vm1, %v3593_v42 }
 0x44a   :  { %3249 = vmatprep.mubr.msk.bf16.mxu1 %vm3617_vm0, %v4902_v11  ;;  %3265 = vmatprep.mubr.msk.bf16.mxu0 %vm3617_vm0, %v4902_v11 }
 0x4fc   :  { %v2003_v17 = vpop.f32.mrb[28].mxu1 }
 0x4fd   :  { %v3219_v25 = vpop.f32.mrb[29].mxu1 }
 0x4fe   :  { %v2006_v31 = vpop.f32.mrb[30].mxu1 }
 0x4ff   :  { %v3220_v52 = vpop.f32.mrb[31].mxu1 }
 0x51c   :  { %v2084_v14 = vpop.f32.mrb[32].mxu1  ;;  %v2232_v58 = vpop.f32.mrb[24].mxu0 }
 0x51d   :  { %v2091_v43 = vsub.f32 %v2003_v17, %v2084_v14  ;;  %v3227_v10 = vpop.f32.mrb[33].mxu1  ;;  %v3243_v49 = vpop.f32.mrb[25].mxu0  ;;  %v2247_v28 = vsel %vm2243_vm8, %v3611_v39, %v2232_v58 }
 0x51e   :  { %v2087_v7 = vpop.f32.mrb[34].mxu1  ;;  %v2235_v24 = vpop.f32.mrb[26].mxu0 }
 0x51f   :  { %v2092_v19 = vsub.f32 %v2006_v31, %v2087_v7  ;;  %v2248_v18 = vsel %vm2244_vm9, %v3613_v21, %v2235_v24  ;;  %v3228_v57 = vpop.f32.mrb[35].mxu1  ;;  %v3244_v22 = vpop.f32.mrb[27].mxu0  ;;  %v2245_v59 = vsel %vm2243_vm8, %v3610_v53, %v2091_v43 }
 0x520   :  { %v3381_v4 = vpack.c.bf16 %v2248_v18, %v2247_v28 }
 0x521   :  { %v2246_v62 = vsel %vm2244_vm9, %v3612_v20, %v2092_v19 }
 0x522   :  { %v3378_v63 = vpack.c.bf16 %v2246_v62, %v2245_v59 }
 0x524   :  { %3379 = vmatpush3.bf16.msra.mxu1 %v3378_v63  ;;  %3385 = vmatpush3.bf16.msra.mxu0 %v3378_v63 }
 0x525   :  { %3380 = vmatprep.subr.bf16.mxu1 %v4899_v15  ;;  %3386 = vmatprep.subr.bf16.mxu0 %v4899_v15  ;;  %v3615_v15 = vld [vmem:[%s4839_s7] sm:$0xff]  }
 0x527   :  { %3250 = vmatmul.mubr.msk.bf16.vlgmr.msra.gmra.mrb[36].mxu1 %vm81_vm1, %v3614_v8  ;;  %3266 = vmatmul.mubr.msk.bf16.vlgmr.msra.gmra.mrb[28].mxu0 %vm81_vm1, %v3615_v15 }
 0x528   :  { %3382 = vmatpush3.bf16.msra.mxu1 %v3381_v4  ;;  %3388 = vmatpush3.bf16.msra.mxu0 %v3381_v4 }
 0x529   :  { %3257 = vmatprep.mubr.msk.bf16.mxu1 %vm3617_vm0, %v4902_v11  ;;  %3273 = vmatprep.mubr.msk.bf16.mxu0 %vm3617_vm0, %v4902_v11  ;;  %v4686_v11 = vld [vmem:[%s4786_s18 + $0x10] sm:$0xff]  }
 0x52a   :  { %3277 = vmatprep.subr.bf16.mxu1 %v4649_v3  ;;  %3296 = vmatprep.subr.bf16.mxu0 %v4654_v5 }
 0x52f   :  { %3258 = vmatmul.mubr.msk.bf16.vlgmr.msra.gmra.mrb[40].mxu1 %vm81_vm1, %v3615_v15 }
 0x530   :  { %3278 = vmatpush3.bf16.msra.mxu1 %v4649_v3 }
 0x531   :  { %3279 = vmatprep.subr.bf16.mxu1 %v4673_v9 }
 0x533   :  { %3274 = vmatmul.mubr.msk.bf16.vlgmr.msra.gmra.mrb[28].mxu0 %vm81_vm1, %v3614_v8 }
 0x534   :  { %3297 = vmatpush3.bf16.msra.mxu0 %v4654_v5  ;;  %3280 = vmatpush3.bf16.msra.mxu1 %v4673_v9 }
 0x535   :  { %3298 = vmatprep.subr.bf16.mxu0 %v4681_v12  ;;  %3281 = vmatprep.subr.bf16.mxu1 %v4686_v11 }
 0x538   :  { %3299 = vmatpush3.bf16.msra.mxu0 %v4681_v12  ;;  %3282 = vmatpush3.bf16.msra.mxu1 %v4686_v11 }
 0x539   :  { %3300 = vmatprep.subr.bf16.mxu0 %v4696_v13  ;;  %3283 = vmatprep.subr.bf16.mxu1 %v3600_v16 }
 0x53c   :  { %3301 = vmatpush3.bf16.msra.mxu0 %v4696_v13  ;;  %3284 = vmatpush3.bf16.msra.mxu1 %v3600_v16 }
 0x53d   :  { %3302 = vmatprep.subr.bf16.mxu0 %v4707_v61  ;;  %3285 = vmatprep.subr.bf16.mxu1 %v3602_v2 }
 0x540   :  { %3303 = vmatpush3.bf16.msra.mxu0 %v4707_v61  ;;  %3286 = vmatpush3.bf16.msra.mxu1 %v3602_v2 }
 0x541   :  { %3304 = vmatprep.subr.bf16.mxu0 %v4717_v26  ;;  %3287 = vmatprep.subr.bf16.mxu1 %v3604_v29 }
 0x544   :  { %3305 = vmatpush3.bf16.msra.mxu0 %v4717_v26  ;;  %3288 = vmatpush3.bf16.msra.mxu1 %v3604_v29 }
 0x545   :  { %3306 = vmatprep.subr.bf16.mxu0 %v3605_v23  ;;  %3289 = vmatprep.subr.bf16.mxu1 %v3606_v60 }
 0x548   :  { %3307 = vmatpush3.bf16.msra.mxu0 %v3605_v23  ;;  %3290 = vmatpush3.bf16.msra.mxu1 %v3606_v60 }
 0x549   :  { %3308 = vmatprep.subr.bf16.mxu0 %v3607_v1  ;;  %3291 = vmatprep.subr.bf16.mxu1 %v3608_v6 }
 0x54c   :  { %3309 = vmatpush3.bf16.msra.mxu0 %v3607_v1  ;;  %3292 = vmatpush3.bf16.msra.mxu1 %v3608_v6 }
 0x54d   :  { %3315 = vmatprep.subr.bf16.mxu1 %v4649_v3  ;;  %3310 = vmatprep.subr.bf16.mxu0 %v3609_v27 }
 0x550   :  { %3311 = vmatpush3.bf16.msra.mxu0 %v3609_v27 }
 0x5fa   :  { %v2315_v30 = vpop.f32.mrb[36].mxu1 }
 0x5fb   :  { %v3251_v32 = vpop.f32.mrb[37].mxu1 }
 0x5fc   :  { %v2318_v34 = vpop.f32.mrb[38].mxu1 }
 0x5fd   :  { %v3252_v35 = vpop.f32.mrb[39].mxu1 }
 0x602   :  { %v2388_v36 = vpop.f32.mrb[40].mxu1 }
 0x603   :  { %v2395_v38 = vsub.f32 %v2315_v30, %v2388_v36  ;;  %v3259_v40 = vpop.f32.mrb[41].mxu1 }
 0x604   :  { %v2391_v42 = vpop.f32.mrb[42].mxu1 }
 0x605   :  { %v2396_v44 = vsub.f32 %v2318_v34, %v2391_v42  ;;  %3293 = vmatprep.mubr.f32.mxu1 %v2395_v38  ;;  %v3260_v46 = vpop.f32.mrb[43].mxu1 }
 0x606   :  { %v2536_v47 = vpop.f32.mrb[28].mxu0 }
 0x607   :  { %v3275_v48 = vpop.f32.mrb[29].mxu0  ;;  %3294 = vmatmul.mubr.f32.vlgmr.msra.gmra.mrb[44].mxu1 %v2396_v44  ;;  %3312 = vmatprep.mubr.f32.mxu0 %v2536_v47 }
 0x608   :  { %3316 = vmatpush3.bf16.msra.mxu1 %v4649_v3  ;;  %v2539_v50 = vpop.f32.mrb[30].mxu0  ;;  %3331 = vmatprep.mubr.f32.mxu1 %v2536_v47 }
 0x609   :  { %3313 = vmatmul.mubr.f32.vlgmr.msra.gmra.mrb[32].mxu0 %v2539_v50  ;;  %3317 = vmatprep.subr.bf16.mxu1 %v4673_v9  ;;  %v3276_v51 = vpop.f32.mrb[31].mxu0 }
 0x60c   :  { %3318 = vmatpush3.bf16.msra.mxu1 %v4673_v9 }
 0x60d   :  { %3319 = vmatprep.subr.bf16.mxu1 %v4686_v11 }
 0x610   :  { %3320 = vmatpush3.bf16.msra.mxu1 %v4686_v11 }
 0x611   :  { %3321 = vmatprep.subr.bf16.mxu1 %v3600_v16 }
 0x614   :  { %3322 = vmatpush3.bf16.msra.mxu1 %v3600_v16 }
 0x615   :  { %3323 = vmatprep.subr.bf16.mxu1 %v3602_v2 }
 0x618   :  { %3324 = vmatpush3.bf16.msra.mxu1 %v3602_v2 }
 0x619   :  { %3325 = vmatprep.subr.bf16.mxu1 %v3604_v29 }
 0x61c   :  { %3326 = vmatpush3.bf16.msra.mxu1 %v3604_v29 }
 0x61d   :  { %3327 = vmatprep.subr.bf16.mxu1 %v3606_v60 }
 0x620   :  { %3328 = vmatpush3.bf16.msra.mxu1 %v3606_v60 }
 0x621   :  { %3329 = vmatprep.subr.bf16.mxu1 %v3608_v6 }
 0x624   :  { %3330 = vmatpush3.bf16.msra.mxu1 %v3608_v6 }
 0x625   :  { %3334 = vmatprep.subr.bf16.mxu1 %v4654_v5 }
 0x627   :  { %3332 = vmatmul.mubr.f32.vlgmr.msra.gmra.mrb[46].mxu1 %v2539_v50 }
 0x628   :  { %3335 = vmatpush3.bf16.msra.mxu1 %v4654_v5  ;;  %3350 = vmatprep.mubr.f32.mxu1 %v2395_v38 }
 0x629   :  { %3336 = vmatprep.subr.bf16.mxu1 %v4681_v12 }
 0x62c   :  { %3337 = vmatpush3.bf16.msra.mxu1 %v4681_v12 }
 0x62d   :  { %3338 = vmatprep.subr.bf16.mxu1 %v4696_v13 }
 0x630   :  { %3339 = vmatpush3.bf16.msra.mxu1 %v4696_v13 }
 0x631   :  { %3340 = vmatprep.subr.bf16.mxu1 %v4707_v61 }
 0x634   :  { %3341 = vmatpush3.bf16.msra.mxu1 %v4707_v61 }
 0x635   :  { %3342 = vmatprep.subr.bf16.mxu1 %v4717_v26 }
 0x638   :  { %3343 = vmatpush3.bf16.msra.mxu1 %v4717_v26 }
 0x639   :  { %3344 = vmatprep.subr.bf16.mxu1 %v3605_v23 }
 0x63c   :  { %3345 = vmatpush3.bf16.msra.mxu1 %v3605_v23 }
 0x63d   :  { %3346 = vmatprep.subr.bf16.mxu1 %v3607_v1 }
 0x640   :  { %3347 = vmatpush3.bf16.msra.mxu1 %v3607_v1 }
 0x641   :  { %3348 = vmatprep.subr.bf16.mxu1 %v3609_v27 }
 0x644   :  { %3349 = vmatpush3.bf16.msra.mxu1 %v3609_v27 }
 0x647   :  { %3351 = vmatmul.mubr.f32.vlgmr.msra.gmra.mrb[46].mxu1 %v2396_v44 }
 0x6da   :  { %v3295_v54 = vpop.f32.mrb[44].mxu1 }
 0x6db   :  { %v2657_v55 = vpop.f32.mrb[45].mxu1 }
 0x6dc   :  { %v3314_v41 = vpop.f32.mrb[32].mxu0 }
 0x6dd   :  { %v2758_v37 = vsub.f32 %v3295_v54, %v3314_v41  ;;  %v2748_v0 = vpop.f32.mrb[33].mxu0 }
 0x6de   :  { %v2757_v56 = vsub.f32 %v2657_v55, %v2748_v0 }
 0x6df   :  { %2846 = vst [vmem:[%s4788_s20 + $0x8] sm:$0xff] %v2758_v37 }
 0x6e0   :  { %2845 = vst [vmem:[%s4788_s20] sm:$0xff] %v2757_v56 }
 0x71a   :  { %v3352_v33 = vpop.f32.mrb[46].mxu1 }
 0x71b   :  { %2848 = vst [vmem:[%s4789_s21 + $0x8] sm:$0xff] %v3352_v33  ;;  %v2836_v45 = vpop.f32.mrb[47].mxu1 }
 0x71c   :  { %2847 = vst [vmem:[%s4789_s21] sm:$0xff] %v2836_v45 }

</bundles_post_ra>
